<compile_context>
chip_gen: v7x
topology: tpu7x:2x2x1
jax: 0.10.0
libtpu: 0.0.40
codegen_flags: <defaults>
</compile_context>

<pallas_src>
import functools

import jax
import jax.numpy as jnp
from jax.experimental import pallas as pl
from jax.experimental.pallas import tpu as pltpu

CHANNEL = 32  # fixed by the module


# ------------------------- kernel -------------------------

def _resblock_kernel(x_ref, w1_ref, b1_ref, w2_ref, b2_ref, o_ref, *,
                     H, W, C, B):
    """x_ref/o_ref: (B, C, H*W). w*_ref: (3, C, 3*C) bf16 (row dy, cols kx*C+ci).
    b*_ref: (C, 1) f32."""
    HW = H * W

    # ---- hoisted spatial boundary masks (built once, shared everywhere) ----
    lane = jax.lax.broadcasted_iota(jnp.int32, (C, HW), 1)
    if W & (W - 1) == 0:                       # power-of-two W: cheap VPU and
        col = jnp.bitwise_and(lane, W - 1)
    else:
        col = lane % W
    top = lane >= W                            # h - 1 >= 0
    bot = lane < (H - 1) * W                   # h + 1 <  H
    left = col >= 1                            # w - 1 >= 0
    right = col < (W - 1)                      # w + 1 <  W
    masks = {
        (-1, -1): jnp.logical_and(top, left),
        (-1, 0): top,
        (-1, 1): jnp.logical_and(top, right),
        (0, -1): left,
        (0, 0): None,
        (0, 1): right,
        (1, -1): jnp.logical_and(bot, left),
        (1, 0): bot,
        (1, 1): jnp.logical_and(bot, right),
    }

    # ---- biases read once; broadcast-add happens once per conv epilogue ----
    b1 = b1_ref[...]                           # (C, 1) f32
    b2 = b2_ref[...]

    def conv3x3(act, w_ref):
        """act: (C, H*W) f32 -> conv3x3(act) (C, H*W) f32 (bias NOT added).

        3 accumulating bf16 MXU dots of K = 3*C, so only 3 taps are live."""
        acc = None
        for dy in (-1, 0, 1):
            taps = []
            for dx in (-1, 0, 1):
                d = dy * W + dx                # flat spatial shift
                if d == 0:
                    t = act
                else:
                    # shifted[p] = act[p + d]; wrap-around entries masked off.
                    t = pltpu.roll(act, shift=(-d) % HW, axis=1)
                m = masks[(dy, dx)]
                if m is not None:
                    t = jnp.where(m, t, 0.0)
                taps.append(t.astype(jnp.bfloat16))
            patches = jnp.concatenate(taps, axis=0)        # (3*C, HW) bf16
            part = jnp.dot(w_ref[dy + 1], patches,
                           preferred_element_type=jnp.float32)
            acc = part if acc is None else acc + part
        return acc

    for b in range(B):                         # static; B images per grid step
        x = x_ref[b].astype(jnp.float32)       # (C, H*W)
        rs1 = jnp.maximum(conv3x3(x, w1_ref) + b1, 0.0)
        rs = conv3x3(rs1, w2_ref) + b2
        o_ref[b] = (x + rs).astype(o_ref.dtype)   # residual, lane-dense store


# ------------------------- wrapper -------------------------

def _pack_weight(w_oihw):
    # (Cout, Cin, 3, 3) -> (3, Cout, 3*Cin); w_p[ky, o, kx*Cin + ci] = w[o, ci, ky, kx]
    co, ci, kh, kw = w_oihw.shape
    return jnp.transpose(w_oihw, (2, 0, 3, 1)).reshape(kh, co, kw * ci)


def _pick_images_per_step(N, C, HW):
    """Largest divisor B of N that keeps the grid extent >= 2 (v7x: both
    TensorCores busy) and the per-step block well inside VMEM."""
    per_image_f32 = C * HW * 4
    budget = 6 * 1024 * 1024
    max_b = max(1, budget // (8 * per_image_f32))
    best = 1
    for b in range(1, N + 1):
        if N % b == 0 and b <= max_b and (N // b >= 2 or N == 1):
            best = b
    return best


def resblock_pallas(x_nchw, w20, b20, w21, b21, *, images_per_step=None):
    """Forward pass of Resblock. x_nchw: (N, 32, H, W). Weights in PyTorch
    OIHW layout (32, 32, 3, 3), biases (32,)."""
    N, C, H, W = x_nchw.shape
    HW = H * W
    x_flat = x_nchw.reshape(N, C, HW)          # free reshape; lanes = H*W

    # bf16 at the MXU boundary (f32 accumulate); biases stay f32.
    w1 = _pack_weight(w20).astype(jnp.bfloat16)
    w2 = _pack_weight(w21).astype(jnp.bfloat16)
    b1 = b20.reshape(C, 1).astype(jnp.float32)
    b2 = b21.reshape(C, 1).astype(jnp.float32)

    B = (images_per_step if images_per_step is not None
         else _pick_images_per_step(N, C, HW))
    assert N % B == 0, (N, B)

    kernel = functools.partial(_resblock_kernel, H=H, W=W, C=C, B=B)

    itemsize = x_nchw.dtype.itemsize
    block_io = 2 * 2 * (B * C * HW * itemsize)        # dbl-buffered in + out
    live_f32 = 8 * C * HW * 4                         # act/rs1/acc/taps/masks
    weights_b = 2 * (3 * C * 3 * C * 2) + 2 * C * 4
    vmem_limit = int(min(64 * 2**20,
                         max(16 * 2**20, 2 * (block_io + live_f32 + weights_b))))

    flops = 2 * 2 * N * C * (9 * C) * HW              # two 3x3 convs
    bytes_acc = 2 * N * C * HW * itemsize + weights_b

    out = pl.pallas_call(
        kernel,
        out_shape=jax.ShapeDtypeStruct((N, C, HW), x_nchw.dtype),
        grid_spec=pltpu.PrefetchScalarGridSpec(
            num_scalar_prefetch=0,
            grid=(N // B,),
            in_specs=[
                pl.BlockSpec((B, C, HW), lambda n: (n, 0, 0)),
                pl.BlockSpec((3, C, 3 * C), lambda n: (0, 0, 0)),
                pl.BlockSpec((C, 1), lambda n: (0, 0)),
                pl.BlockSpec((3, C, 3 * C), lambda n: (0, 0, 0)),
                pl.BlockSpec((C, 1), lambda n: (0, 0)),
            ],
            out_specs=pl.BlockSpec((B, C, HW), lambda n: (n, 0, 0)),
        ),
        compiler_params=pltpu.CompilerParams(
            dimension_semantics=("parallel",),
            vmem_limit_bytes=vmem_limit),
        cost_estimate=pl.CostEstimate(flops=flops, transcendentals=0,
                                      bytes_accessed=bytes_acc),
    )(x_flat, w1, b1, w2, b2)
    return out.reshape(N, C, H, W)


# ------------------------- reference (plain JAX, f32) -------------------------

def _conv_ref(x_nchw, w_oihw, bias):
    y = jax.lax.conv_general_dilated(
        x_nchw, w_oihw, window_strides=(1, 1), padding="SAME",
        dimension_numbers=("NCHW", "OIHW", "NCHW"))
    return y + bias.reshape(1, -1, 1, 1)


def resblock_ref(x_nchw, w20, b20, w21, b21):
    rs1 = jax.nn.relu(_conv_ref(x_nchw, w20, b20))
    return x_nchw + _conv_ref(rs1, w21, b21)


# ------------------------- main -------------------------

if __name__ == "__main__":
    key = jax.random.PRNGKey(0)
    k_x, k_w20, k_b20, k_w21, k_b21 = jax.random.split(key, 5)

    N, C, H, W = 2, CHANNEL, 16, 16
    x = jax.random.normal(k_x, (N, C, H, W), dtype=jnp.float32)

    # Deterministic parameter init (PyTorch Conv2d shapes: OIHW + bias).
    fan_in = C * 3 * 3
    scale = 1.0 / jnp.sqrt(fan_in)
    w20 = jax.random.uniform(k_w20, (C, C, 3, 3), jnp.float32, -scale, scale)
    b20 = jax.random.uniform(k_b20, (C,), jnp.float32, -scale, scale)
    w21 = jax.random.uniform(k_w21, (C, C, 3, 3), jnp.float32, -scale, scale)
    b21 = jax.random.uniform(k_b21, (C,), jnp.float32, -scale, scale)

    out = jax.block_until_ready(
        jax.jit(resblock_pallas)(x, w20, b20, w21, b21))
    ref = jax.block_until_ready(
        jax.jit(resblock_ref)(x, w20, b20, w21, b21))

    assert out.shape == (N, C, H, W), out.shape
    err = float(jnp.max(jnp.abs(out - ref)))
    # bf16 MXU operands (f32 accumulate) vs. the f32 conv reference: expect
    # max-abs error of a few 1e-3; 2e-2 is a comfortable bound.
    assert jnp.allclose(out, ref, rtol=2e-2, atol=2e-2), err
    print("KERNEL_OK")
</pallas_src>

<mosaic_0001>
module attributes {stable_mosaic.version = 11 : i64} {
  func.func @_resblock_kernel(%arg0: i32, %arg1: memref<1x32x256xf32, #tpu.memory_space<vmem>>, %arg2: memref<3x32x96xbf16, #tpu.memory_space<vmem>>, %arg3: memref<32x1xf32, #tpu.memory_space<vmem>>, %arg4: memref<3x32x96xbf16, #tpu.memory_space<vmem>>, %arg5: memref<32x1xf32, #tpu.memory_space<vmem>>, %arg6: memref<1x32x256xf32, #tpu.memory_space<vmem>>) attributes {dimension_semantics = [#tpu.dimension_semantics<parallel>], iteration_bounds = array<i64: 2>, scalar_prefetch = 0 : i64, scratch_operands = 0 : i64, tpu.core_type = #tpu.core_type<tc>, window_params = [{transform_indices = @transform_0, window_bounds = array<i64: 1, 32, 256>}, {pipeline_mode = #tpu.pipeline_mode<synchronous>, transform_indices = @transform_1, window_bounds = array<i64: 3, 32, 96>}, {pipeline_mode = #tpu.pipeline_mode<synchronous>, transform_indices = @transform_2, window_bounds = array<i64: 32, 1>}, {pipeline_mode = #tpu.pipeline_mode<synchronous>, transform_indices = @transform_3, window_bounds = array<i64: 3, 32, 96>}, {pipeline_mode = #tpu.pipeline_mode<synchronous>, transform_indices = @transform_4, window_bounds = array<i64: 32, 1>}, {transform_indices = @transform_5, window_bounds = array<i64: 1, 32, 256>}]} {
    %0 = tpu.iota {dimensions = array<i32: 1>} : vector<32x256xi32>
    %c15_i32 = arith.constant 15 : i32
    %1 = vector.broadcast %c15_i32 : i32 to vector<32x256xi32>
    %2 = arith.andi %0, %1 : vector<32x256xi32>
    %c16_i32 = arith.constant 16 : i32
    %3 = vector.broadcast %c16_i32 : i32 to vector<32x256xi32>
    %4 = arith.cmpi sge, %0, %3 : vector<32x256xi32>
    %c240_i32 = arith.constant 240 : i32
    %5 = vector.broadcast %c240_i32 : i32 to vector<32x256xi32>
    %6 = arith.cmpi slt, %0, %5 : vector<32x256xi32>
    %c1_i32 = arith.constant 1 : i32
    %7 = vector.broadcast %c1_i32 : i32 to vector<32x256xi32>
    %8 = arith.cmpi sge, %2, %7 : vector<32x256xi32>
    %c15_i32_0 = arith.constant 15 : i32
    %9 = vector.broadcast %c15_i32_0 : i32 to vector<32x256xi32>
    %10 = arith.cmpi slt, %2, %9 : vector<32x256xi32>
    %11 = arith.andi %4, %8 : vector<32x256xi1>
    %12 = arith.andi %4, %10 : vector<32x256xi1>
    %13 = arith.andi %6, %8 : vector<32x256xi1>
    %14 = arith.andi %6, %10 : vector<32x256xi1>
    %c0 = arith.constant 0 : index
    %c0_1 = arith.constant 0 : index
    %15 = vector.load %arg3[%c0, %c0_1] : memref<32x1xf32, #tpu.memory_space<vmem>>, vector<32x1xf32>
    %c0_2 = arith.constant 0 : index
    %c0_3 = arith.constant 0 : index
    %16 = vector.load %arg5[%c0_2, %c0_3] : memref<32x1xf32, #tpu.memory_space<vmem>>, vector<32x1xf32>
    %c0_4 = arith.constant 0 : index
    %c0_5 = arith.constant 0 : index
    %c0_6 = arith.constant 0 : index
    %17 = vector.load %arg1[%c0_4, %c0_5, %c0_6] : memref<1x32x256xf32, #tpu.memory_space<vmem>>, vector<1x32x256xf32>
    %18 = vector.shape_cast %17 : vector<1x32x256xf32> to vector<32x256xf32>
    %c17_i32 = arith.constant 17 : i32
    %19 = tpu.dynamic_rotate %18 by %c17_i32 dim 1 : vector<32x256xf32>, i32 -> vector<32x256xf32>
    %cst = arith.constant 0.000000e+00 : f32
    %20 = vector.broadcast %cst : f32 to vector<32x256xf32>
    %21 = arith.select %11, %19, %20 : vector<32x256xi1>, vector<32x256xf32>
    %22 = arith.truncf %21 : vector<32x256xf32> to vector<32x256xbf16>
    %c16_i32_7 = arith.constant 16 : i32
    %23 = tpu.dynamic_rotate %18 by %c16_i32_7 dim 1 : vector<32x256xf32>, i32 -> vector<32x256xf32>
    %cst_8 = arith.constant 0.000000e+00 : f32
    %24 = vector.broadcast %cst_8 : f32 to vector<32x256xf32>
    %25 = arith.select %4, %23, %24 : vector<32x256xi1>, vector<32x256xf32>
    %26 = arith.truncf %25 : vector<32x256xf32> to vector<32x256xbf16>
    %c15_i32_9 = arith.constant 15 : i32
    %27 = tpu.dynamic_rotate %18 by %c15_i32_9 dim 1 : vector<32x256xf32>, i32 -> vector<32x256xf32>
    %cst_10 = arith.constant 0.000000e+00 : f32
    %28 = vector.broadcast %cst_10 : f32 to vector<32x256xf32>
    %29 = arith.select %12, %27, %28 : vector<32x256xi1>, vector<32x256xf32>
    %30 = arith.truncf %29 : vector<32x256xf32> to vector<32x256xbf16>
    %31 = tpu.concatenate %22, %26, %30 in 0 : vector<32x256xbf16>, vector<32x256xbf16>, vector<32x256xbf16> -> vector<96x256xbf16>
    %c0_11 = arith.constant 0 : index
    %c0_12 = arith.constant 0 : index
    %c0_13 = arith.constant 0 : index
    %32 = vector.load %arg2[%c0_11, %c0_12, %c0_13] : memref<3x32x96xbf16, #tpu.memory_space<vmem>>, vector<1x32x96xbf16>
    %33 = vector.shape_cast %32 : vector<1x32x96xbf16> to vector<32x96xbf16>
    %cst_14 = arith.constant dense<0.000000e+00> : vector<32x256xf32>
    %34 = tpu.matmul %33, %31, %cst_14 {dimension_numbers = #tpu.dot_dimension_numbers<[1], [0], [0], [1], [0, 0, 1, 1], [], []>} : vector<32x96xbf16>, vector<96x256xbf16>, vector<32x256xf32> -> vector<32x256xf32>
    %c1_i32_15 = arith.constant 1 : i32
    %35 = tpu.dynamic_rotate %18 by %c1_i32_15 dim 1 : vector<32x256xf32>, i32 -> vector<32x256xf32>
    %cst_16 = arith.constant 0.000000e+00 : f32
    %36 = vector.broadcast %cst_16 : f32 to vector<32x256xf32>
    %37 = arith.select %8, %35, %36 : vector<32x256xi1>, vector<32x256xf32>
    %38 = arith.truncf %37 : vector<32x256xf32> to vector<32x256xbf16>
    %39 = arith.truncf %18 : vector<32x256xf32> to vector<32x256xbf16>
    %c255_i32 = arith.constant 255 : i32
    %40 = tpu.dynamic_rotate %18 by %c255_i32 dim 1 : vector<32x256xf32>, i32 -> vector<32x256xf32>
    %cst_17 = arith.constant 0.000000e+00 : f32
    %41 = vector.broadcast %cst_17 : f32 to vector<32x256xf32>
    %42 = arith.select %10, %40, %41 : vector<32x256xi1>, vector<32x256xf32>
    %43 = arith.truncf %42 : vector<32x256xf32> to vector<32x256xbf16>
    %44 = tpu.concatenate %38, %39, %43 in 0 : vector<32x256xbf16>, vector<32x256xbf16>, vector<32x256xbf16> -> vector<96x256xbf16>
    %c1 = arith.constant 1 : index
    %c0_18 = arith.constant 0 : index
    %c0_19 = arith.constant 0 : index
    %45 = vector.load %arg2[%c1, %c0_18, %c0_19] : memref<3x32x96xbf16, #tpu.memory_space<vmem>>, vector<1x32x96xbf16>
    %46 = vector.shape_cast %45 : vector<1x32x96xbf16> to vector<32x96xbf16>
    %cst_20 = arith.constant dense<0.000000e+00> : vector<32x256xf32>
    %47 = tpu.matmul %46, %44, %cst_20 {dimension_numbers = #tpu.dot_dimension_numbers<[1], [0], [0], [1], [0, 0, 1, 1], [], []>} : vector<32x96xbf16>, vector<96x256xbf16>, vector<32x256xf32> -> vector<32x256xf32>
    %48 = arith.addf %34, %47 : vector<32x256xf32>
    %c241_i32 = arith.constant 241 : i32
    %49 = tpu.dynamic_rotate %18 by %c241_i32 dim 1 : vector<32x256xf32>, i32 -> vector<32x256xf32>
    %cst_21 = arith.constant 0.000000e+00 : f32
    %50 = vector.broadcast %cst_21 : f32 to vector<32x256xf32>
    %51 = arith.select %13, %49, %50 : vector<32x256xi1>, vector<32x256xf32>
    %52 = arith.truncf %51 : vector<32x256xf32> to vector<32x256xbf16>
    %c240_i32_22 = arith.constant 240 : i32
    %53 = tpu.dynamic_rotate %18 by %c240_i32_22 dim 1 : vector<32x256xf32>, i32 -> vector<32x256xf32>
    %cst_23 = arith.constant 0.000000e+00 : f32
    %54 = vector.broadcast %cst_23 : f32 to vector<32x256xf32>
    %55 = arith.select %6, %53, %54 : vector<32x256xi1>, vector<32x256xf32>
    %56 = arith.truncf %55 : vector<32x256xf32> to vector<32x256xbf16>
    %c239_i32 = arith.constant 239 : i32
    %57 = tpu.dynamic_rotate %18 by %c239_i32 dim 1 : vector<32x256xf32>, i32 -> vector<32x256xf32>
    %cst_24 = arith.constant 0.000000e+00 : f32
    %58 = vector.broadcast %cst_24 : f32 to vector<32x256xf32>
    %59 = arith.select %14, %57, %58 : vector<32x256xi1>, vector<32x256xf32>
    %60 = arith.truncf %59 : vector<32x256xf32> to vector<32x256xbf16>
    %61 = tpu.concatenate %52, %56, %60 in 0 : vector<32x256xbf16>, vector<32x256xbf16>, vector<32x256xbf16> -> vector<96x256xbf16>
    %c2 = arith.constant 2 : index
    %c0_25 = arith.constant 0 : index
    %c0_26 = arith.constant 0 : index
    %62 = vector.load %arg2[%c2, %c0_25, %c0_26] : memref<3x32x96xbf16, #tpu.memory_space<vmem>>, vector<1x32x96xbf16>
    %63 = vector.shape_cast %62 : vector<1x32x96xbf16> to vector<32x96xbf16>
    %cst_27 = arith.constant dense<0.000000e+00> : vector<32x256xf32>
    %64 = tpu.matmul %63, %61, %cst_27 {dimension_numbers = #tpu.dot_dimension_numbers<[1], [0], [0], [1], [0, 0, 1, 1], [], []>} : vector<32x96xbf16>, vector<96x256xbf16>, vector<32x256xf32> -> vector<32x256xf32>
    %65 = arith.addf %48, %64 : vector<32x256xf32>
    %66 = vector.broadcast %15 : vector<32x1xf32> to vector<32x256xf32>
    %67 = arith.addf %65, %66 : vector<32x256xf32>
    %cst_28 = arith.constant 0.000000e+00 : f32
    %68 = vector.broadcast %cst_28 : f32 to vector<32x256xf32>
    %69 = arith.maximumf %67, %68 : vector<32x256xf32>
    %c17_i32_29 = arith.constant 17 : i32
    %70 = tpu.dynamic_rotate %69 by %c17_i32_29 dim 1 : vector<32x256xf32>, i32 -> vector<32x256xf32>
    %cst_30 = arith.constant 0.000000e+00 : f32
    %71 = vector.broadcast %cst_30 : f32 to vector<32x256xf32>
    %72 = arith.select %11, %70, %71 : vector<32x256xi1>, vector<32x256xf32>
    %73 = arith.truncf %72 : vector<32x256xf32> to vector<32x256xbf16>
    %c16_i32_31 = arith.constant 16 : i32
    %74 = tpu.dynamic_rotate %69 by %c16_i32_31 dim 1 : vector<32x256xf32>, i32 -> vector<32x256xf32>
    %cst_32 = arith.constant 0.000000e+00 : f32
    %75 = vector.broadcast %cst_32 : f32 to vector<32x256xf32>
    %76 = arith.select %4, %74, %75 : vector<32x256xi1>, vector<32x256xf32>
    %77 = arith.truncf %76 : vector<32x256xf32> to vector<32x256xbf16>
    %c15_i32_33 = arith.constant 15 : i32
    %78 = tpu.dynamic_rotate %69 by %c15_i32_33 dim 1 : vector<32x256xf32>, i32 -> vector<32x256xf32>
    %cst_34 = arith.constant 0.000000e+00 : f32
    %79 = vector.broadcast %cst_34 : f32 to vector<32x256xf32>
    %80 = arith.select %12, %78, %79 : vector<32x256xi1>, vector<32x256xf32>
    %81 = arith.truncf %80 : vector<32x256xf32> to vector<32x256xbf16>
    %82 = tpu.concatenate %73, %77, %81 in 0 : vector<32x256xbf16>, vector<32x256xbf16>, vector<32x256xbf16> -> vector<96x256xbf16>
    %c0_35 = arith.constant 0 : index
    %c0_36 = arith.constant 0 : index
    %c0_37 = arith.constant 0 : index
    %83 = vector.load %arg4[%c0_35, %c0_36, %c0_37] : memref<3x32x96xbf16, #tpu.memory_space<vmem>>, vector<1x32x96xbf16>
    %84 = vector.shape_cast %83 : vector<1x32x96xbf16> to vector<32x96xbf16>
    %cst_38 = arith.constant dense<0.000000e+00> : vector<32x256xf32>
    %85 = tpu.matmul %84, %82, %cst_38 {dimension_numbers = #tpu.dot_dimension_numbers<[1], [0], [0], [1], [0, 0, 1, 1], [], []>} : vector<32x96xbf16>, vector<96x256xbf16>, vector<32x256xf32> -> vector<32x256xf32>
    %c1_i32_39 = arith.constant 1 : i32
    %86 = tpu.dynamic_rotate %69 by %c1_i32_39 dim 1 : vector<32x256xf32>, i32 -> vector<32x256xf32>
    %cst_40 = arith.constant 0.000000e+00 : f32
    %87 = vector.broadcast %cst_40 : f32 to vector<32x256xf32>
    %88 = arith.select %8, %86, %87 : vector<32x256xi1>, vector<32x256xf32>
    %89 = arith.truncf %88 : vector<32x256xf32> to vector<32x256xbf16>
    %90 = arith.truncf %69 : vector<32x256xf32> to vector<32x256xbf16>
    %c255_i32_41 = arith.constant 255 : i32
    %91 = tpu.dynamic_rotate %69 by %c255_i32_41 dim 1 : vector<32x256xf32>, i32 -> vector<32x256xf32>
    %cst_42 = arith.constant 0.000000e+00 : f32
    %92 = vector.broadcast %cst_42 : f32 to vector<32x256xf32>
    %93 = arith.select %10, %91, %92 : vector<32x256xi1>, vector<32x256xf32>
    %94 = arith.truncf %93 : vector<32x256xf32> to vector<32x256xbf16>
    %95 = tpu.concatenate %89, %90, %94 in 0 : vector<32x256xbf16>, vector<32x256xbf16>, vector<32x256xbf16> -> vector<96x256xbf16>
    %c1_43 = arith.constant 1 : index
    %c0_44 = arith.constant 0 : index
    %c0_45 = arith.constant 0 : index
    %96 = vector.load %arg4[%c1_43, %c0_44, %c0_45] : memref<3x32x96xbf16, #tpu.memory_space<vmem>>, vector<1x32x96xbf16>
    %97 = vector.shape_cast %96 : vector<1x32x96xbf16> to vector<32x96xbf16>
    %cst_46 = arith.constant dense<0.000000e+00> : vector<32x256xf32>
    %98 = tpu.matmul %97, %95, %cst_46 {dimension_numbers = #tpu.dot_dimension_numbers<[1], [0], [0], [1], [0, 0, 1, 1], [], []>} : vector<32x96xbf16>, vector<96x256xbf16>, vector<32x256xf32> -> vector<32x256xf32>
    %99 = arith.addf %85, %98 : vector<32x256xf32>
    %c241_i32_47 = arith.constant 241 : i32
    %100 = tpu.dynamic_rotate %69 by %c241_i32_47 dim 1 : vector<32x256xf32>, i32 -> vector<32x256xf32>
    %cst_48 = arith.constant 0.000000e+00 : f32
    %101 = vector.broadcast %cst_48 : f32 to vector<32x256xf32>
    %102 = arith.select %13, %100, %101 : vector<32x256xi1>, vector<32x256xf32>
    %103 = arith.truncf %102 : vector<32x256xf32> to vector<32x256xbf16>
    %c240_i32_49 = arith.constant 240 : i32
    %104 = tpu.dynamic_rotate %69 by %c240_i32_49 dim 1 : vector<32x256xf32>, i32 -> vector<32x256xf32>
    %cst_50 = arith.constant 0.000000e+00 : f32
    %105 = vector.broadcast %cst_50 : f32 to vector<32x256xf32>
    %106 = arith.select %6, %104, %105 : vector<32x256xi1>, vector<32x256xf32>
    %107 = arith.truncf %106 : vector<32x256xf32> to vector<32x256xbf16>
    %c239_i32_51 = arith.constant 239 : i32
    %108 = tpu.dynamic_rotate %69 by %c239_i32_51 dim 1 : vector<32x256xf32>, i32 -> vector<32x256xf32>
    %cst_52 = arith.constant 0.000000e+00 : f32
    %109 = vector.broadcast %cst_52 : f32 to vector<32x256xf32>
    %110 = arith.select %14, %108, %109 : vector<32x256xi1>, vector<32x256xf32>
    %111 = arith.truncf %110 : vector<32x256xf32> to vector<32x256xbf16>
    %112 = tpu.concatenate %103, %107, %111 in 0 : vector<32x256xbf16>, vector<32x256xbf16>, vector<32x256xbf16> -> vector<96x256xbf16>
    %c2_53 = arith.constant 2 : index
    %c0_54 = arith.constant 0 : index
    %c0_55 = arith.constant 0 : index
    %113 = vector.load %arg4[%c2_53, %c0_54, %c0_55] : memref<3x32x96xbf16, #tpu.memory_space<vmem>>, vector<1x32x96xbf16>
    %114 = vector.shape_cast %113 : vector<1x32x96xbf16> to vector<32x96xbf16>
    %cst_56 = arith.constant dense<0.000000e+00> : vector<32x256xf32>
    %115 = tpu.matmul %114, %112, %cst_56 {dimension_numbers = #tpu.dot_dimension_numbers<[1], [0], [0], [1], [0, 0, 1, 1], [], []>} : vector<32x96xbf16>, vector<96x256xbf16>, vector<32x256xf32> -> vector<32x256xf32>
    %116 = arith.addf %99, %115 : vector<32x256xf32>
    %117 = vector.broadcast %16 : vector<32x1xf32> to vector<32x256xf32>
    %118 = arith.addf %116, %117 : vector<32x256xf32>
    %119 = arith.addf %18, %118 : vector<32x256xf32>
    %c0_57 = arith.constant 0 : index
    %c0_58 = arith.constant 0 : index
    %c0_59 = arith.constant 0 : index
    %120 = vector.load %arg6[%c0_57, %c0_58, %c0_59] : memref<1x32x256xf32, #tpu.memory_space<vmem>>, vector<1x32x256xf32>
    %121 = vector.shape_cast %120 : vector<1x32x256xf32> to vector<32x256xf32>
    %122 = vector.shape_cast %119 : vector<32x256xf32> to vector<1x32x256xf32>
    tpu.vector_store %arg6[%c0_57, %c0_58, %c0_59], %122 {strides = array<i32>} : memref<1x32x256xf32, #tpu.memory_space<vmem>>, vector<1x32x256xf32>,
    return
  }
  func.func @transform_0(%arg0: i32) -> (i32, i32, i32) {
    %c0_i32 = arith.constant 0 : i32
    %c0_i32_0 = arith.constant 0 : i32
    %c0_i32_1 = arith.constant 0 : i32
    return %arg0, %c0_i32, %c0_i32_0 : i32, i32, i32
  }
  func.func @transform_1(%arg0: i32) -> (i32, i32, i32) {
    %c0_i32 = arith.constant 0 : i32
    %c0_i32_0 = arith.constant 0 : i32
    %c0_i32_1 = arith.constant 0 : i32
    %c0_i32_2 = arith.constant 0 : i32
    return %c0_i32, %c0_i32_0, %c0_i32_1 : i32, i32, i32
  }
  func.func @transform_2(%arg0: i32) -> (i32, i32) {
    %c0_i32 = arith.constant 0 : i32
    %c0_i32_0 = arith.constant 0 : i32
    %c0_i32_1 = arith.constant 0 : i32
    return %c0_i32, %c0_i32_0 : i32, i32
  }
  func.func @transform_3(%arg0: i32) -> (i32, i32, i32) {
    %c0_i32 = arith.constant 0 : i32
    %c0_i32_0 = arith.constant 0 : i32
    %c0_i32_1 = arith.constant 0 : i32
    %c0_i32_2 = arith.constant 0 : i32
    return %c0_i32, %c0_i32_0, %c0_i32_1 : i32, i32, i32
  }
  func.func @transform_4(%arg0: i32) -> (i32, i32) {
    %c0_i32 = arith.constant 0 : i32
    %c0_i32_0 = arith.constant 0 : i32
    %c0_i32_1 = arith.constant 0 : i32
    return %c0_i32, %c0_i32_0 : i32, i32
  }
  func.func @transform_5(%arg0: i32) -> (i32, i32, i32) {
    %c0_i32 = arith.constant 0 : i32
    %c0_i32_0 = arith.constant 0 : i32
    %c0_i32_1 = arith.constant 0 : i32
    return %arg0, %c0_i32, %c0_i32_0 : i32, i32, i32
  }
}

</mosaic_0001>

<bundles_post_ra>
// kernel: resblock_pallas.1
= control target key start
LH: loop header
LB: loop body
LE: loop exit
PB: predicated region body
PF: predicated region fallthrough
CT: control target
= control target key end

     0   :  { %s2108_s18 = smov 0   ;;  %s2833_s0 = inlined_call_operand.vmem [shape: f32[2,32,256], index: 0, kind: input, shape index: {}]   ;;  %s2834_s1 = inlined_call_operand.vmem [shape: bf16[3,32,96], index: 1, kind: input, shape index: {}]   ;;  %s2835_s2 = inlined_call_operand.vmem [shape: f32[32,1], index: 2, kind: input, shape index: {}]   ;;  %s2836_s3 = inlined_call_operand.vmem [shape: bf16[3,32,96], index: 3, kind: input, shape index: {}]   ;;  %s2837_s4 = inlined_call_operand.vmem [shape: f32[32,1], index: 4, kind: input, shape index: {}]   ;;  %s2838_s5 = inlined_call_operand.vmem [shape: f32[2,32,256], index: 5, kind: output, shape index: {}]  }
   0x1 LB: > { %s1449_s19 = sadd.s32 4294967295, %s2067_s18   ;;  %p1453_p0 = scmp.ge.s32.totalorder %s2067_s18, 1  ;;  %s2067_s18 = sphi %s2108_s18, %s15_s18  }
   0x2   : > { %p187_p1 = scmp.lt.s32.totalorder %s2067_s18, 3 }
   0x4   : > { %p188_p2 = pnand %p1453_p0, %p187_p1 }
   0x5   : > { %p215_p3 = scmp.lt.s32.totalorder (!%p188_p2), %s1449_s19, 1  ;;  %s2069_s24 = smov (!%p188_p2), 1   ;;  %v2072_v12 = vmov (!%p188_p2), 0   ;;  %v247_v13 = vld [vmem:[%s2835_s2] sm:$0xff] (!%p188_p2)  ;;  %v248_v14 = vld [vmem:[%s2835_s2 + $0x8] sm:$0xff] (!%p188_p2)  ;;  %v249_v15 = vld [vmem:[%s2835_s2 + $0x10] sm:$0xff] (!%p188_p2)  ;;  %v226_v17 = vlaneseq (!%p188_p2) }
   0x6   : > { %191 = sbr.rel (%p188_p2) target bundleno = 861 (0x35d), region = 40  ;;  %s2070_s25 = smov (!%p188_p2), 127   ;;  %510 = vmatprep.mubr.bf16.mxu0 (!%p188_p2), %v2072_v12  ;;  %1879 = vset.pattern.permute.xlu0 (!%p188_p2), %v2072_v12  ;;  %v250_v16 = vld [vmem:[%s2835_s2 + $0x18] sm:$0xff] (!%p188_p2)  ;;  %vm471_vm14 = vcmask (!%p188_p2), 785408  }
   0x7   : > { %s2071_s26 = smov (!%p188_p2), 17   ;;  %1070 = vmatprep.mubr.bf16.mxu1 (!%p188_p2), %v2072_v12  ;;  %1880 = vset.pattern.permute.xlu1 (!%p188_p2), %v2072_v12  ;;  %s2073_s27 = smov (!%p188_p2), 16   ;;  %v2206_v18 = vand.u32 (!%p188_p2), 127, %v226_v17 }
   0x8   : > { %s2074_s28 = smov (!%p188_p2), 15   ;;  %s2075_s29 = smov (!%p188_p2), 113  }
   0x9   : > { %s2076_s30 = smov (!%p188_p2), 112   ;;  %s2077_s6 = smov (!%p188_p2), 111   ;;  %v2209_v19 = vadd.s32 (!%p188_p2), 128, %v2206_v18  ;;  %v229_v23 = vand.u32 (!%p188_p2), 15, %v2206_v18  ;;  %vm394_vm0 = vcmp.lt.s32.totalorder (!%p188_p2), %v2206_v18, 1  ;;  %vm2841_vm5 = vcmp.lt.s32.totalorder (!%p188_p2), %v2206_v18, 127 }
   0xa   : > { %vm2840_vm9 = vcmp.lt.s32.totalorder (!%p188_p2), %v2206_v18, 17  ;;  %vm231_vm11 = vcmp.ge.s32.totalorder (!%p188_p2), %v2206_v18, 16  ;;  %vm2839_vm13 = vcmp.lt.s32.totalorder (!%p188_p2), %v2206_v18, 16 }
   0xb   : > { %v230_v22 = vand.u32 (!%p188_p2), 15, %v2209_v19  ;;  %vm2220_vm2 = vcmp.ge.s32.totalorder (!%p188_p2), %v229_v23, 1  ;;  %vm2296_vm8 = vcmp.lt.s32.totalorder (!%p188_p2), %v229_v23, 15 }
   0xc   : > { %vm2246_vm4 = vmpackc.low (!%p188_p2), %vm2220_vm2, %vm2220_vm2 }
   0xd   : > { %s2919_s19 = smov (!%p215_p3, %s1449_s19), 1  ;;  %vm2214_vm1 = vcmp.ge.s32.totalorder %v230_v22, 1  ;;  %vm2273_vm6 = vcmp.lt.s32.totalorder %v230_v22, 15  ;;  %vm2310_vm10 = vmpackc.low %vm2296_vm8, %vm2296_vm8 }
   0xe   : > { %s1668_s20 = sshll.u32 %s2919_s19, 6  ;;  %vm2235_vm3 = vmpackc.low %vm2214_vm1, %vm2214_vm1 }
   0xf   : > { %s2124_s23 = scalar_lea.vmem %s2833_s0, %s1668_s20  ;;  %vm2290_vm7 = vmpackc.low %vm2273_vm6, %vm2273_vm6 }
  0x10   : > { %v2127_v0 = vld [vmem:[%s2124_s23 + $0x20] sm:$0xff]  ;;  %v2130_v1 = vld [vmem:[%s2124_s23 + $0x30] sm:$0xff]  ;;  %v2141_v5 = vld [vmem:[%s2124_s23 + $0x28] sm:$0xff] }
  0x11   : > { %v2133_v2 = vld [vmem:[%s2124_s23] sm:$0xff]  ;;  %v1729_v3 = vpack.i.bf16 %v2130_v1, %v2127_v0  ;;  %v2138_v4 = vld [vmem:[%s2124_s23 + $0x10] sm:$0xff]  ;;  %v2144_v6 = vld [vmem:[%s2124_s23 + $0x38] sm:$0xff] }
  0x12   : > { %v1719_v7 = vpack.i.bf16 %v2138_v4, %v2133_v2  ;;  %v2149_v8 = vld [vmem:[%s2124_s23 + $0x8] sm:$0xff]  ;;  %v2152_v9 = vld [vmem:[%s2124_s23 + $0x18] sm:$0xff]  ;;  %v1734_v10 = vpack.i.bf16 %v2144_v6, %v2141_v5  ;;  %v415_v59 = vpack.c.bf16 %v2138_v4, %v2133_v2  ;;  %v418_v63 = vpack.c.bf16 %v2144_v6, %v2141_v5  ;;  %vm239_vm12 = vmand %vm231_vm11, %vm2220_vm2 }
  0x13   : > { %1730 = vrot.lane.b32.xlu1 %v1729_v3, %s2069_s24  ;;  %v1724_v11 = vpack.i.bf16 %v2152_v9, %v2149_v8  ;;  %v416_v51 = vpack.c.bf16 %v2152_v9, %v2149_v8  ;;  %v417_v5 = vpack.c.bf16 %v2130_v1, %v2127_v0  ;;  %vm2347_vm15 = vmpackc.low %vm239_vm12, %vm239_vm12  ;;  %vm353_vm2 = vcmp.lt.s32.totalorder %v2206_v18, 15 }
  0x14   : > { %1720 = vrot.lane.b32.xlu0 %v1719_v7, %s2069_s24  ;;  %vm2382_vm12 = vmpackc.low %vm231_vm11, %vm231_vm11 }
  0x17   : > { %1735 = vrot.lane.b32.xlu1 %v1734_v10, %s2069_s24 }
  0x18   : > { %1725 = vrot.lane.b32.xlu0 %v1724_v11, %s2069_s24 }
  0x1b   : > { %1745 = vrot.lane.b32.xlu1 %v1724_v11, %s2070_s25 }
  0x1c   : > { %1740 = vrot.lane.b32.xlu0 %v1719_v7, %s2070_s25 }
  0x1f   : > { %1755 = vrot.lane.b32.xlu1 %v1734_v10, %s2070_s25 }
  0x20   : > { %1750 = vrot.lane.b32.xlu0 %v1729_v3, %s2070_s25 }
  0x23   : > { %1765 = vrot.lane.b32.xlu1 %v1724_v11, %s2071_s26 }
  0x24   : > { %1760 = vrot.lane.b32.xlu0 %v1719_v7, %s2071_s26 }
  0x27   : > { %1775 = vrot.lane.b32.xlu1 %v1734_v10, %s2071_s26 }
  0x28   : > { %1770 = vrot.lane.b32.xlu0 %v1729_v3, %s2071_s26 }
  0x2b   : > { %1785 = vrot.lane.b32.xlu1 %v1724_v11, %s2073_s27 }
  0x2c   : > { %1780 = vrot.lane.b32.xlu0 %v1719_v7, %s2073_s27 }
  0x2f   : > { %1795 = vrot.lane.b32.xlu1 %v1734_v10, %s2073_s27 }
  0x30   : > { %1790 = vrot.lane.b32.xlu0 %v1729_v3, %s2073_s27 }
  0x33   : > { %1805 = vrot.lane.b32.xlu1 %v1724_v11, %s2074_s28 }
  0x34   : > { %1800 = vrot.lane.b32.xlu0 %v1719_v7, %s2074_s28 }
  0x37   : > { %1815 = vrot.lane.b32.xlu1 %v1734_v10, %s2074_s28 }
  0x38   : > { %1810 = vrot.lane.b32.xlu0 %v1729_v3, %s2074_s28 }
  0x3b   : > { %1825 = vrot.lane.b32.xlu1 %v1724_v11, %s2075_s29 }
  0x3c   : > { %1820 = vrot.lane.b32.xlu0 %v1719_v7, %s2075_s29 }
  0x3f   : > { %1835 = vrot.lane.b32.xlu1 %v1734_v10, %s2075_s29 }
  0x40   : > { %1830 = vrot.lane.b32.xlu0 %v1729_v3, %s2075_s29 }
  0x43   : > { %1845 = vrot.lane.b32.xlu1 %v1724_v11, %s2076_s30 }
  0x44   : > { %1840 = vrot.lane.b32.xlu0 %v1719_v7, %s2076_s30 }
  0x47   : > { %1855 = vrot.lane.b32.xlu1 %v1734_v10, %s2076_s30 }
  0x48   : > { %1850 = vrot.lane.b32.xlu0 %v1729_v3, %s2076_s30 }
  0x4b   : > { %1865 = vrot.lane.b32.xlu1 %v1724_v11, %s2077_s6 }
  0x4c   : > { %1860 = vrot.lane.b32.xlu0 %v1719_v7, %s2077_s6 }
  0x4f   : > { %1875 = vrot.lane.b32.xlu1 %v1734_v10, %s2077_s6 }
  0x50   : > { %1870 = vrot.lane.b32.xlu0 %v1729_v3, %s2077_s6 }
  0x53   : > { %800 = vperm.xlu1 %1880, %v248_v14  }
  0x54   : > { %795 = vperm.xlu0 %1879, %v247_v13  }
  0x57   : > { %805 = vperm.xlu1 %1880, %v249_v15  }
  0x58   : > { %810 = vperm.xlu0 %1879, %v250_v16  }
  0x85   : > { %v1731_v20 = vpop.permute.xlu1 %1730 }
  0x86   : > { %v1721_v21 = vpop.permute.xlu0 %1720  ;;  %v1733_v24 = vunpack.i.h.bf16 %v1731_v20  ;;  %v1732_v25 = vunpack.i.l.bf16 %v1731_v20 }
  0x87   : > { %v1723_v32 = vunpack.i.h.bf16 %v1721_v21  ;;  %v1722_v33 = vunpack.i.l.bf16 %v1721_v21 }
  0x89   : > { %v1736_v26 = vpop.permute.xlu1 %1735 }
  0x8a   : > { %v1738_v27 = vunpack.i.h.bf16 %v1736_v26  ;;  %v1737_v28 = vunpack.i.l.bf16 %v1736_v26  ;;  %v1726_v29 = vpop.permute.xlu0 %1725 }
  0x8b   : > { %v1728_v34 = vunpack.i.h.bf16 %v1726_v29  ;;  %v1727_v35 = vunpack.i.l.bf16 %v1726_v29 }
  0x8c   : > { %v397_v36 = vsel %vm394_vm0, %v1732_v25, %v1737_v28  ;;  %v398_v37 = vsel %vm394_vm0, %v1733_v24, %v1738_v27  ;;  %v401_v48 = vsel %vm394_vm0, %v1737_v28, %v1732_v25  ;;  %v402_v49 = vsel %vm394_vm0, %v1738_v27, %v1733_v24 }
  0x8d   : > { %v395_v38 = vsel %vm394_vm0, %v1722_v33, %v1727_v35  ;;  %v396_v39 = vsel %vm394_vm0, %v1723_v32, %v1728_v34  ;;  %v1746_v41 = vpop.permute.xlu1 %1745  ;;  %v399_v43 = vsel %vm394_vm0, %v1727_v35, %v1722_v33  ;;  %v400_v44 = vsel %vm394_vm0, %v1728_v34, %v1723_v32 }
  0x8e   : > { %v1465_v42 = vpack.c.bf16 %v396_v39, %v395_v38  ;;  %v1741_v46 = vpop.permute.xlu0 %1740  ;;  %v1468_v47 = vpack.c.bf16 %v400_v44, %v399_v43  ;;  %v1471_v50 = vpack.c.bf16 %v398_v37, %v397_v36  ;;  %v1748_v53 = vunpack.i.h.bf16 %v1746_v41 }
  0x8f   : > { %v1747_v54 = vunpack.i.l.bf16 %v1746_v41  ;;  %v1743_v55 = vunpack.i.h.bf16 %v1741_v46  ;;  %v1742_v56 = vunpack.i.l.bf16 %v1741_v46  ;;  %v1474_v58 = vpack.c.bf16 %v402_v49, %v401_v48 }
  0x90   : > { %1466 = vmatprep.subr.msk.bf16.mxu0 %vm2235_vm3, %v1465_v42 }
  0x91   : > { %1469 = vmatpush1.bf16.msk.msra.mxu0 %vm2246_vm4, %v1468_v47  ;;  %v1756_v52 = vpop.permute.xlu1 %1755  ;;  %v441_v61 = vsel %vm2841_vm5, %v1748_v53, %v1743_v55  ;;  %v440_v62 = vsel %vm2841_vm5, %v1747_v54, %v1742_v56  ;;  %v437_v2 = vsel %vm2841_vm5, %v1743_v55, %v1748_v53  ;;  %v436_v4 = vsel %vm2841_vm5, %v1742_v56, %v1747_v54 }
  0x92   : > { %1472 = vmatprep.subr.msk.bf16.mxu0 %vm2235_vm3, %v1471_v50  ;;  %v1751_v57 = vpop.permute.xlu0 %1750  ;;  %v1758_v7 = vunpack.i.h.bf16 %v1756_v52  ;;  %v1757_v8 = vunpack.i.l.bf16 %v1756_v52  ;;  %v1477_v13 = vpack.c.bf16 %v441_v61, %v440_v62  ;;  %v1480_v1 = vpack.c.bf16 %v437_v2, %v436_v4  ;;  %v2041_v52 = vld [vmem:[%s2834_s1 + $0x10] sm:$0xff]  }
  0x93   : > { %v1753_v9 = vunpack.i.h.bf16 %v1751_v57  ;;  %v1752_v10 = vunpack.i.l.bf16 %v1751_v57 }
  0x95   : > { %1475 = vmatpush1.bf16.msk.msra.mxu0 %vm2246_vm4, %v1474_v58  ;;  %v1766_v60 = vpop.permute.xlu1 %1765  ;;  %v443_v21 = vsel %vm2841_vm5, %v1758_v7, %v1753_v9  ;;  %v442_v22 = vsel %vm2841_vm5, %v1757_v8, %v1752_v10  ;;  %v439_v25 = vsel %vm2841_vm5, %v1753_v9, %v1758_v7  ;;  %v438_v27 = vsel %vm2841_vm5, %v1752_v10, %v1757_v8 }
  0x96   : > { %482 = vmatprep.subr.bf16.mxu0 %v416_v51  ;;  %v1761_v3 = vpop.permute.xlu0 %1760  ;;  %v1768_v14 = vunpack.i.h.bf16 %v1766_v60  ;;  %v1767_v15 = vunpack.i.l.bf16 %v1766_v60  ;;  %v1483_v28 = vpack.c.bf16 %v443_v21, %v442_v22  ;;  %v1486_v38 = vpack.c.bf16 %v439_v25, %v438_v27 }
  0x97   : > { %v1763_v16 = vunpack.i.h.bf16 %v1761_v3  ;;  %v1762_v17 = vunpack.i.l.bf16 %v1761_v3  ;;  %vm234_vm5 = vcmp.lt.s32.totalorder %v2209_v19, 240 }
  0x99   : > { %483 = vmatpush1.bf16.msra.mxu0 %v415_v59  ;;  %v1776_v6 = vpop.permute.xlu1 %1775  ;;  %v281_v29 = vsel %vm2840_vm9, %v1763_v16, %v1768_v14  ;;  %v280_v32 = vsel %vm2840_vm9, %v1762_v17, %v1767_v15  ;;  %v285_v39 = vsel %vm2840_vm9, %v1768_v14, %v1763_v16  ;;  %v284_v41 = vsel %vm2840_vm9, %v1767_v15, %v1762_v17  ;;  %v2042_v17 = vld [vmem:[%s2834_s1 + $0x18] sm:$0xff]  }
  0x9a   : > { %484 = vmatprep.subr.bf16.mxu0 %v418_v63  ;;  %v1771_v20 = vpop.permute.xlu0 %1770  ;;  %v1778_v34 = vunpack.i.h.bf16 %v1776_v6  ;;  %v1777_v35 = vunpack.i.l.bf16 %v1776_v6  ;;  %v1493_v42 = vpack.c.bf16 %v281_v29, %v280_v32  ;;  %v1496_v53 = vpack.c.bf16 %v285_v39, %v284_v41 }
  0x9b   : > { %v1773_v36 = vunpack.i.h.bf16 %v1771_v20  ;;  %v1772_v37 = vunpack.i.l.bf16 %v1771_v20 }
  0x9d   : > { %485 = vmatpush1.bf16.msra.mxu0 %v417_v5  ;;  %v1786_v26 = vpop.permute.xlu1 %1785  ;;  %v283_v50 = vsel %vm2840_vm9, %v1773_v36, %v1778_v34  ;;  %v282_v51 = vsel %vm2840_vm9, %v1772_v37, %v1777_v35  ;;  %v287_v54 = vsel %vm2840_vm9, %v1778_v34, %v1773_v36  ;;  %v286_v31 = vsel %vm2840_vm9, %v1777_v35, %v1772_v37 }
  0x9e   : > { %1478 = vmatprep.subr.msk.bf16.mxu0 %vm2290_vm7, %v1477_v13  ;;  %v1781_v33 = vpop.permute.xlu0 %1780  ;;  %v1788_v44 = vunpack.i.h.bf16 %v1786_v26  ;;  %v1787_v46 = vunpack.i.l.bf16 %v1786_v26  ;;  %v1499_v56 = vpack.c.bf16 %v283_v50, %v282_v51  ;;  %v1502_v7 = vpack.c.bf16 %v287_v54, %v286_v31 }
  0x9f   : > { %v1783_v47 = vunpack.i.h.bf16 %v1781_v33  ;;  %v1782_v48 = vunpack.i.l.bf16 %v1781_v33  ;;  %vm2842_vm9 = vcmp.lt.s32.totalorder %v2206_v18, 113 }
  0xa1   : > { %1481 = vmatpush1.bf16.msk.msra.mxu0 %vm2310_vm10, %v1480_v1  ;;  %v1796_v43 = vpop.permute.xlu1 %1795  ;;  %v317_v58 = vsel %vm2839_vm13, %v1782_v48, %v1787_v46  ;;  %v318_v59 = vsel %vm2839_vm13, %v1783_v47, %v1788_v44  ;;  %v322_v8 = vsel %vm2839_vm13, %v1788_v44, %v1783_v47  ;;  %v321_v9 = vsel %vm2839_vm13, %v1787_v46, %v1782_v48 }
  0xa2   : > { %1484 = vmatprep.subr.msk.bf16.mxu0 %vm2290_vm7, %v1483_v28  ;;  %v1791_v49 = vpop.permute.xlu0 %1790  ;;  %v1798_v61 = vunpack.i.h.bf16 %v1796_v43  ;;  %v1797_v62 = vunpack.i.l.bf16 %v1796_v43  ;;  %v334_v10 = vpack.c.bf16 %v318_v59, %v317_v58  ;;  %v1505_v20 = vpack.c.bf16 %v322_v8, %v321_v9 }
  0xa3   : > { %v1793_v63 = vunpack.i.h.bf16 %v1791_v49  ;;  %v1792_v3 = vunpack.i.l.bf16 %v1791_v49 }
  0xa5   : > { %1487 = vmatpush1.bf16.msk.msra.mxu0 %vm2310_vm10, %v1486_v38  ;;  %v1806_v55 = vpop.permute.xlu1 %1805  ;;  %v319_v15 = vsel %vm2839_vm13, %v1792_v3, %v1797_v62  ;;  %v320_v16 = vsel %vm2839_vm13, %v1793_v63, %v1798_v61  ;;  %v324_v21 = vsel %vm2839_vm13, %v1798_v61, %v1793_v63  ;;  %v323_v1 = vsel %vm2839_vm13, %v1797_v62, %v1792_v3  ;;  %vm241_vm13 = vmand %vm231_vm11, %vm2296_vm8 }
  0xa6   : > { %1494 = vmatprep.subr.msk.bf16.mxu0 %vm2235_vm3, %v1493_v42  ;;  %v1801_v60 = vpop.permute.xlu0 %1800  ;;  %v1808_v4 = vunpack.i.h.bf16 %v1806_v55  ;;  %v1807_v13 = vunpack.i.l.bf16 %v1806_v55  ;;  %v336_v28 = vpack.c.bf16 %v320_v16, %v319_v15  ;;  %v1508_v36 = vpack.c.bf16 %v324_v21, %v323_v1  ;;  %vm2416_vm8 = vmpackc.low %vm241_vm13, %vm241_vm13 }
  0xa7   : > { %v1803_v5 = vunpack.i.h.bf16 %v1801_v60  ;;  %v1802_v6 = vunpack.i.l.bf16 %v1801_v60  ;;  %vm244_vm11 = vmand %vm234_vm5, %vm2214_vm1  ;;  %vm2843_vm13 = vcmp.lt.s32.totalorder %v2206_v18, 112 }
  0xa8   : > { %1488 = vmatmul.mubr.msk.bf16.vlgmr.msra.gmra.mrb[0].mxu0 %vm471_vm14, %v2041_v52  ;;  %vm2440_vm1 = vmpackc.low %vm244_vm11, %vm244_vm11 }
  0xa9   : > { %1497 = vmatpush1.bf16.msk.msra.mxu0 %vm2347_vm15, %v1496_v53  ;;  %v1816_v2 = vpop.permute.xlu1 %1815  ;;  %520 = vmatprep.mubr.bf16.mxu0 %v2072_v12  ;;  %v355_v26 = vsel %vm353_vm2, %v1803_v5, %v1808_v4  ;;  %v354_v27 = vsel %vm353_vm2, %v1802_v6, %v1807_v13  ;;  %v359_v37 = vsel %vm353_vm2, %v1808_v4, %v1803_v5  ;;  %vm2477_vm11 = vmpackc.low %vm234_vm5, %vm234_vm5 }
  0xaa   : > { %1500 = vmatprep.subr.msk.bf16.mxu0 %vm2235_vm3, %v1499_v56  ;;  %v1811_v14 = vpop.permute.xlu0 %1810  ;;  %v1818_v32 = vunpack.i.h.bf16 %v1816_v2  ;;  %v1817_v33 = vunpack.i.l.bf16 %v1816_v2  ;;  %v358_v38 = vsel %vm353_vm2, %v1807_v13, %v1802_v6  ;;  %v1511_v39 = vpack.c.bf16 %v355_v26, %v354_v27 }
  0xab   : > { %v1813_v34 = vunpack.i.h.bf16 %v1811_v14  ;;  %v1812_v35 = vunpack.i.l.bf16 %v1811_v14  ;;  %v1514_v50 = vpack.c.bf16 %v359_v37, %v358_v38  ;;  %v2043_v14 = vld [vmem:[%s2834_s1] sm:$0xff]  }
  0xad   : > { %1503 = vmatpush1.bf16.msk.msra.mxu0 %vm2347_vm15, %v1502_v7  ;;  %v1826_v22 = vpop.permute.xlu1 %1825  ;;  %v357_v48 = vsel %vm353_vm2, %v1813_v34, %v1818_v32  ;;  %v356_v49 = vsel %vm353_vm2, %v1812_v35, %v1817_v33  ;;  %v361_v51 = vsel %vm353_vm2, %v1818_v32, %v1813_v34  ;;  %v360_v53 = vsel %vm353_vm2, %v1817_v33, %v1812_v35 }
  0xae   : > { %551 = vmatprep.subr.bf16.mxu0 %v334_v10  ;;  %v1821_v29 = vpop.permute.xlu0 %1820  ;;  %v1828_v42 = vunpack.i.h.bf16 %v1826_v22  ;;  %v1827_v43 = vunpack.i.l.bf16 %v1826_v22  ;;  %v1517_v54 = vpack.c.bf16 %v357_v48, %v356_v49  ;;  %v1520_v62 = vpack.c.bf16 %v361_v51, %v360_v53  ;;  %v2044_v48 = vld [vmem:[%s2834_s1 + $0x8] sm:$0xff]  }
  0xaf   : > { %v1823_v44 = vunpack.i.h.bf16 %v1821_v29  ;;  %v1822_v46 = vunpack.i.l.bf16 %v1821_v29 }
  0xb0   : > { %1489 = vmatmul.mubr.msk.bf16.gmra.mrb[4].mxu0 %vm471_vm14, %v2042_v17 }
  0xb1   : > { %1506 = vmatpush1.bf16.msk.msra.mxu0 %vm2382_vm12, %v1505_v20  ;;  %v1836_v41 = vpop.permute.xlu1 %1835  ;;  %579 = vmatprep.mubr.bf16.mxu0 %v2072_v12  ;;  %v622_v55 = vsel %vm2842_vm9, %v1828_v42, %v1823_v44  ;;  %v621_v31 = vsel %vm2842_vm9, %v1827_v43, %v1822_v46  ;;  %v618_v63 = vsel %vm2842_vm9, %v1823_v44, %v1828_v42 }
  0xb2   : > { %553 = vmatprep.subr.bf16.mxu0 %v336_v28  ;;  %v1831_v47 = vpop.permute.xlu0 %1830  ;;  %v1838_v58 = vunpack.i.h.bf16 %v1836_v41  ;;  %v1837_v59 = vunpack.i.l.bf16 %v1836_v41  ;;  %v617_v3 = vsel %vm2842_vm9, %v1822_v46, %v1827_v43  ;;  %v1531_v7 = vpack.c.bf16 %v622_v55, %v621_v31 }
  0xb3   : > { %v1833_v60 = vunpack.i.h.bf16 %v1831_v47  ;;  %v1832_v61 = vunpack.i.l.bf16 %v1831_v47  ;;  %v1534_v15 = vpack.c.bf16 %v618_v63, %v617_v3 }
  0xb5   : > { %1509 = vmatpush1.bf16.msk.msra.mxu0 %vm2382_vm12, %v1508_v36  ;;  %v1846_v52 = vpop.permute.xlu1 %1845  ;;  %v624_v13 = vsel %vm2842_vm9, %v1838_v58, %v1833_v60  ;;  %v623_v5 = vsel %vm2842_vm9, %v1837_v59, %v1832_v61  ;;  %v620_v16 = vsel %vm2842_vm9, %v1833_v60, %v1838_v58  ;;  %v619_v17 = vsel %vm2842_vm9, %v1832_v61, %v1837_v59 }
  0xb6   : > { %1512 = vmatprep.subr.msk.bf16.mxu0 %vm2290_vm7, %v1511_v39  ;;  %v1841_v56 = vpop.permute.xlu0 %1840  ;;  %v1848_v9 = vunpack.i.h.bf16 %v1846_v52  ;;  %v1847_v30 = vunpack.i.l.bf16 %v1846_v52  ;;  %v1537_v20 = vpack.c.bf16 %v624_v13, %v623_v5  ;;  %v1540_v33 = vpack.c.bf16 %v620_v16, %v619_v17 }
  0xb7   : > { %v1843_v10 = vunpack.i.h.bf16 %v1841_v56  ;;  %v1842_v2 = vunpack.i.l.bf16 %v1841_v56  ;;  %vm2844_vm9 = vcmp.lt.s32.totalorder %v2206_v18, 111 }
  0xb9   : > { %1515 = vmatpush1.bf16.msk.msra.mxu0 %vm2416_vm8, %v1514_v50  ;;  %v1856_v8 = vpop.permute.xlu1 %1855  ;;  %v659_v21 = vsel %vm2843_vm13, %v1848_v9, %v1843_v10  ;;  %v658_v22 = vsel %vm2843_vm13, %v1847_v30, %v1842_v2  ;;  %v655_v34 = vsel %vm2843_vm13, %v1843_v10, %v1848_v9  ;;  %v654_v35 = vsel %vm2843_vm13, %v1842_v2, %v1847_v30  ;;  %v2045_v10 = vld [vmem:[%s2834_s1 + $0x20] sm:$0xff]   ;;  %v2046_v2 = vld [vmem:[%s2834_s1 + $0x28] sm:$0xff]  }
  0xba   : > { %1518 = vmatprep.subr.msk.bf16.mxu0 %vm2290_vm7, %v1517_v54  ;;  %v1851_v4 = vpop.permute.xlu0 %1850  ;;  %v1858_v27 = vunpack.i.h.bf16 %v1856_v8  ;;  %v1857_v28 = vunpack.i.l.bf16 %v1856_v8  ;;  %v1543_v36 = vpack.c.bf16 %v659_v21, %v658_v22  ;;  %v670_v49 = vpack.c.bf16 %v655_v34, %v654_v35 }
  0xbb   : > { %v1853_v29 = vunpack.i.h.bf16 %v1851_v4  ;;  %v1852_v32 = vunpack.i.l.bf16 %v1851_v4 }
  0xbd   : > { %1521 = vmatpush1.bf16.msk.msra.mxu0 %vm2416_vm8, %v1520_v62  ;;  %v1866_v1 = vpop.permute.xlu1 %1865  ;;  %v661_v42 = vsel %vm2843_vm13, %v1858_v27, %v1853_v29  ;;  %v660_v43 = vsel %vm2843_vm13, %v1857_v28, %v1852_v32  ;;  %v657_v50 = vsel %vm2843_vm13, %v1853_v29, %v1858_v27  ;;  %v656_v51 = vsel %vm2843_vm13, %v1852_v32, %v1857_v28  ;;  %vm246_vm13 = vmand %vm234_vm5, %vm2273_vm6 }
  0xbe   : > { %1532 = vmatprep.subr.msk.bf16.mxu0 %vm2440_vm1, %v1531_v7  ;;  %v1861_v26 = vpop.permute.xlu0 %1860  ;;  %v1868_v37 = vunpack.i.h.bf16 %v1866_v1  ;;  %v1867_v38 = vunpack.i.l.bf16 %v1866_v1  ;;  %v1546_v52 = vpack.c.bf16 %v661_v42, %v660_v43  ;;  %v672_v59 = vpack.c.bf16 %v657_v50, %v656_v51  ;;  %vm2513_vm5 = vmpackc.low %vm246_vm13, %vm246_vm13 }
  0xbf   : > { %v1863_v39 = vunpack.i.h.bf16 %v1861_v26  ;;  %v1862_v41 = vunpack.i.l.bf16 %v1861_v26 }
  0xc0   : > { %1522 = vmatmul.mubr.msk.bf16.vlgmr.msra.gmra.mrb[0].mxu0 %vm471_vm14, %v2043_v14 }
  0xc1   : > { %1535 = vmatpush1.bf16.msk.msra.mxu0 %vm2246_vm4, %v1534_v15  ;;  %589 = vmatprep.mubr.bf16.mxu0 %v2072_v12  ;;  %v1876_v46 = vpop.permute.xlu1 %1875  ;;  %v696_v53 = vsel %vm2844_vm9, %v1868_v37, %v1863_v39  ;;  %v695_v54 = vsel %vm2844_vm9, %v1867_v38, %v1862_v41  ;;  %v692_v60 = vsel %vm2844_vm9, %v1863_v39, %v1868_v37 }
  0xc2   : > { %1538 = vmatprep.subr.msk.bf16.mxu0 %vm2440_vm1, %v1537_v20  ;;  %v1871_v47 = vpop.permute.xlu0 %1870  ;;  %v1878_v55 = vunpack.i.h.bf16 %v1876_v46  ;;  %v1877_v31 = vunpack.i.l.bf16 %v1876_v46  ;;  %v691_v61 = vsel %vm2844_vm9, %v1862_v41, %v1867_v38  ;;  %v1549_v62 = vpack.c.bf16 %v696_v53, %v695_v54 }
  0xc3   : > { %v1873_v56 = vunpack.i.h.bf16 %v1871_v47  ;;  %v1872_v58 = vunpack.i.l.bf16 %v1871_v47  ;;  %v1552_v3 = vpack.c.bf16 %v692_v60, %v691_v61 }
  0xc5   : > { %1541 = vmatpush1.bf16.msk.msra.mxu0 %vm2246_vm4, %v1540_v33  ;;  %v698_v11 = vsel %vm2844_vm9, %v1878_v55, %v1873_v56  ;;  %v697_v19 = vsel %vm2844_vm9, %v1877_v31, %v1872_v58  ;;  %v694_v7 = vsel %vm2844_vm9, %v1873_v56, %v1878_v55  ;;  %v693_v8 = vsel %vm2844_vm9, %v1872_v58, %v1877_v31  ;;  %v251_v31 = vld [vmem:[%s2837_s4] sm:$0xff]  ;;  %v252_v56 = vld [vmem:[%s2837_s4 + $0x8] sm:$0xff]  ;;  %v253_v58 = vld [vmem:[%s2837_s4 + $0x10] sm:$0xff] }
  0xc6   : > { %1544 = vmatprep.subr.msk.bf16.mxu0 %vm2477_vm11, %v1543_v36  ;;  %v1555_v9 = vpack.c.bf16 %v698_v11, %v697_v19  ;;  %v1558_v30 = vpack.c.bf16 %v694_v7, %v693_v8 }
  0xc8   : > { %1523 = vmatmul.mubr.msk.bf16.gmra.mrb[4].mxu0 %vm471_vm14, %v2044_v48 }
  0xc9   : > { %737 = vmatpush1.bf16.msra.mxu0 %v670_v49  ;;  %764 = vmatprep.mubr.bf16.mxu0 %v2072_v12 }
  0xca   : > { %1547 = vmatprep.subr.msk.bf16.mxu0 %vm2477_vm11, %v1546_v52 }
  0xcd   : > { %739 = vmatpush1.bf16.msra.mxu0 %v672_v59  ;;  %v254_v59 = vld [vmem:[%s2837_s4 + $0x18] sm:$0xff] }
  0xce   : > { %1550 = vmatprep.subr.msk.bf16.mxu0 %vm2513_vm5, %v1549_v62 }
  0xd1   : > { %1553 = vmatpush1.bf16.msk.msra.mxu0 %vm2310_vm10, %v1552_v3 }
  0xd2   : > { %1556 = vmatprep.subr.msk.bf16.mxu0 %vm2513_vm5, %v1555_v9  ;;  %v801_v5 = vpop.permute.xlu1 %800 }
  0xd3   : > { %v796_v4 = vpop.permute.xlu0 %795 }
  0xd5   : > { %1559 = vmatpush1.bf16.msk.msra.mxu0 %vm2310_vm10, %v1558_v30 }
  0xd6   : > { %v806_v29 = vpop.permute.xlu1 %805 }
  0xd7   : > { %v811_v37 = vpop.permute.xlu0 %810 }
  0xd8   : > { %1560 = vmatmul.mubr.msk.bf16.vlgmr.msra.gmra.mrb[0].mxu0 %vm471_vm14, %v2045_v10 }
  0xd9   : > { %774 = vmatprep.mubr.bf16.mxu0 %v2072_v12 }
  0xe0   : > { %1561 = vmatmul.mubr.msk.bf16.gmra.mrb[4].mxu0 %vm471_vm14, %v2046_v2 }
 0x1ab   : > { %v766_v13 = vpop.f32.mrb[0].mxu0 }
 0x1ac   : > { %v813_v14 = vadd.f32 %v796_v4, %v766_v13  ;;  %v768_v15 = vpop.f32.mrb[1].mxu0 }
 0x1ad   : > { %v814_v16 = vadd.f32 %v796_v4, %v768_v15  ;;  %v770_v17 = vpop.f32.mrb[2].mxu0 }
 0x1ae   : > { %v815_v20 = vadd.f32 %v801_v5, %v770_v17  ;;  %v772_v21 = vpop.f32.mrb[3].mxu0  ;;  %v821_v1 = vmax.f32 %v813_v14, 0.0 }
 0x1af   : > { %v816_v22 = vadd.f32 %v801_v5, %v772_v21  ;;  %v822_v27 = vmax.f32 %v814_v16, 0.0 }
 0x1b0   : > { %v823_v26 = vmax.f32 %v815_v20, 0.0 }
 0x1b1   : > { %v824_v28 = vmax.f32 %v816_v22, 0.0 }
 0x1b2   : > { %v1881_v32 = vpack.i.bf16 %v823_v26, %v821_v1  ;;  %v2542_v47 = vpack.c.bf16 %v823_v26, %v821_v1 }
 0x1b3   : > { %v776_v33 = vpop.f32.mrb[4].mxu0  ;;  %v1886_v34 = vpack.i.bf16 %v824_v28, %v822_v27  ;;  %v2540_v46 = vpack.c.bf16 %v824_v28, %v822_v27 }
 0x1b4   : > { %v817_v35 = vadd.f32 %v806_v29, %v776_v33  ;;  %1882 = vrot.lane.b32.xlu1 %v1881_v32, %s2069_s24  ;;  %v778_v36 = vpop.f32.mrb[5].mxu0 }
 0x1b5   : > { %v818_v38 = vadd.f32 %v806_v29, %v778_v36  ;;  %1887 = vrot.lane.b32.xlu0 %v1886_v34, %s2069_s24  ;;  %v780_v39 = vpop.f32.mrb[6].mxu0 }
 0x1b6   : > { %v819_v41 = vadd.f32 %v811_v37, %v780_v39  ;;  %v782_v42 = vpop.f32.mrb[7].mxu0  ;;  %v825_v48 = vmax.f32 %v817_v35, 0.0 }
 0x1b7   : > { %v820_v43 = vadd.f32 %v811_v37, %v782_v42  ;;  %v826_v50 = vmax.f32 %v818_v38, 0.0 }
 0x1b8   : > { %v827_v49 = vmax.f32 %v819_v41, 0.0 }
 0x1b9   : > { %v828_v51 = vmax.f32 %v820_v43, 0.0 }
 0x1ba   : > { %v1891_v52 = vpack.i.bf16 %v827_v49, %v825_v48  ;;  %v2548_v55 = vpack.c.bf16 %v827_v49, %v825_v48 }
 0x1bb   : > { %v1896_v53 = vpack.i.bf16 %v828_v51, %v826_v50  ;;  %v2546_v54 = vpack.c.bf16 %v828_v51, %v826_v50 }
 0x1bc   : > { %1892 = vrot.lane.b32.xlu1 %v1891_v52, %s2069_s24 }
 0x1bd   : > { %1897 = vrot.lane.b32.xlu0 %v1896_v53, %s2069_s24 }
 0x1c0   : > { %1902 = vrot.lane.b32.xlu1 %v1881_v32, %s2070_s25 }
 0x1c1   : > { %1907 = vrot.lane.b32.xlu0 %v1886_v34, %s2070_s25 }
 0x1c4   : > { %1912 = vrot.lane.b32.xlu1 %v1891_v52, %s2070_s25 }
 0x1c5   : > { %1922 = vrot.lane.b32.xlu0 %v1896_v53, %s2070_s25  ;;  %s2812_s25 = scalar_lea.vmem %s2838_s5, %s1668_s20 }
 0x1c8   : > { %1917 = vrot.lane.b32.xlu1 %v1881_v32, %s2071_s26 }
 0x1c9   : > { %1927 = vrot.lane.b32.xlu0 %v1886_v34, %s2071_s26 }
 0x1cc   : > { %1932 = vrot.lane.b32.xlu1 %v1891_v52, %s2071_s26 }
 0x1cd   : > { %1942 = vrot.lane.b32.xlu0 %v1896_v53, %s2071_s26 }
 0x1d0   : > { %1937 = vrot.lane.b32.xlu1 %v1881_v32, %s2073_s27 }
 0x1d1   : > { %1947 = vrot.lane.b32.xlu0 %v1886_v34, %s2073_s27 }
 0x1d4   : > { %1952 = vrot.lane.b32.xlu1 %v1891_v52, %s2073_s27 }
 0x1d5   : > { %1962 = vrot.lane.b32.xlu0 %v1896_v53, %s2073_s27 }
 0x1d8   : > { %1957 = vrot.lane.b32.xlu1 %v1881_v32, %s2074_s28 }
 0x1d9   : > { %1967 = vrot.lane.b32.xlu0 %v1886_v34, %s2074_s28 }
 0x1dc   : > { %1972 = vrot.lane.b32.xlu1 %v1891_v52, %s2074_s28 }
 0x1dd   : > { %1982 = vrot.lane.b32.xlu0 %v1896_v53, %s2074_s28 }
 0x1e0   : > { %1977 = vrot.lane.b32.xlu1 %v1881_v32, %s2075_s29 }
 0x1e1   : > { %1987 = vrot.lane.b32.xlu0 %v1886_v34, %s2075_s29 }
 0x1e4   : > { %1992 = vrot.lane.b32.xlu1 %v1891_v52, %s2075_s29 }
 0x1e5   : > { %2002 = vrot.lane.b32.xlu0 %v1896_v53, %s2075_s29 }
 0x1e8   : > { %1997 = vrot.lane.b32.xlu1 %v1881_v32, %s2076_s30 }
 0x1e9   : > { %2007 = vrot.lane.b32.xlu0 %v1886_v34, %s2076_s30 }
 0x1ec   : > { %2012 = vrot.lane.b32.xlu1 %v1891_v52, %s2076_s30 }
 0x1ed   : > { %2022 = vrot.lane.b32.xlu0 %v1896_v53, %s2076_s30 }
 0x1f0   : > { %2017 = vrot.lane.b32.xlu1 %v1881_v32, %s2077_s6 }
 0x1f1   : > { %2027 = vrot.lane.b32.xlu0 %v1886_v34, %s2077_s6 }
 0x1f4   : > { %2032 = vrot.lane.b32.xlu1 %v1891_v52, %s2077_s6 }
 0x1f5   : > { %2037 = vrot.lane.b32.xlu0 %v1896_v53, %s2077_s6 }
 0x1f8   : > { %1352 = vperm.xlu1 %1880, %v251_v31  }
 0x1f9   : > { %1357 = vperm.xlu0 %1879, %v252_v56  }
 0x1fc   : > { %1362 = vperm.xlu1 %1880, %v253_v58  }
 0x1fd   : > { %1367 = vperm.xlu0 %1879, %v254_v59  }
 0x226   : > { %v1883_v60 = vpop.permute.xlu1 %1882 }
 0x227   : > { %v1885_v61 = vunpack.i.h.bf16 %v1883_v60  ;;  %v1884_v62 = vunpack.i.l.bf16 %v1883_v60  ;;  %v1888_v11 = vpop.permute.xlu0 %1887 }
 0x228   : > { %v1890_v19 = vunpack.i.h.bf16 %v1888_v11  ;;  %v1889_v3 = vunpack.i.l.bf16 %v1888_v11 }
 0x22a   : > { %v957_v7 = vsel %vm394_vm0, %v1884_v62, %v1889_v3  ;;  %v958_v8 = vsel %vm394_vm0, %v1885_v61, %v1890_v19  ;;  %v961_v9 = vsel %vm394_vm0, %v1889_v3, %v1884_v62  ;;  %v962_v30 = vsel %vm394_vm0, %v1890_v19, %v1885_v61 }
 0x22b   : > { %v1569_v10 = vpack.c.bf16 %v958_v8, %v957_v7  ;;  %v1572_v2 = vpack.c.bf16 %v962_v30, %v961_v9 }
 0x22d   : > { %1570 = vmatprep.subr.msk.bf16.mxu1 %vm2235_vm3, %v1569_v10 }
 0x22e   : > { %1573 = vmatpush1.bf16.msk.msra.mxu1 %vm2246_vm4, %v1572_v2  ;;  %v1893_v4 = vpop.permute.xlu1 %1892 }
 0x22f   : > { %v1895_v13 = vunpack.i.h.bf16 %v1893_v4  ;;  %v1894_v5 = vunpack.i.l.bf16 %v1893_v4  ;;  %v1898_v14 = vpop.permute.xlu0 %1897 }
 0x230   : > { %v1900_v15 = vunpack.i.h.bf16 %v1898_v14  ;;  %v1899_v16 = vunpack.i.l.bf16 %v1898_v14 }
 0x232   : > { %v960_v17 = vsel %vm394_vm0, %v1895_v13, %v1900_v15  ;;  %v964_v20 = vsel %vm394_vm0, %v1900_v15, %v1895_v13  ;;  %v959_v21 = vsel %vm394_vm0, %v1894_v5, %v1899_v16  ;;  %v963_v22 = vsel %vm394_vm0, %v1899_v16, %v1894_v5  ;;  %v1903_v1 = vpop.permute.xlu1 %1902 }
 0x233   : > { %v1575_v26 = vpack.c.bf16 %v960_v17, %v959_v21  ;;  %v1578_v27 = vpack.c.bf16 %v964_v20, %v963_v22  ;;  %v1908_v28 = vpop.permute.xlu0 %1907  ;;  %v1905_v29 = vunpack.i.h.bf16 %v1903_v1  ;;  %v1904_v32 = vunpack.i.l.bf16 %v1903_v1  ;;  %v2047_v20 = vld [vmem:[%s2836_s3 + $0x10] sm:$0xff]  }
 0x234   : > { %v1910_v33 = vunpack.i.h.bf16 %v1908_v28  ;;  %v1909_v34 = vunpack.i.l.bf16 %v1908_v28  ;;  %vm2873_vm0 = vcmp.lt.s32.totalorder %v2206_v18, 127 }
 0x235   : > { %1576 = vmatprep.subr.msk.bf16.mxu1 %vm2235_vm3, %v1575_v26  ;;  %vm2874_vm6 = vmmov %vm2873_vm0 }
 0x236   : > { %v1913_v35 = vpop.permute.xlu1 %1912  ;;  %1579 = vmatpush1.bf16.msk.msra.mxu1 %vm2246_vm4, %v1578_v27  ;;  %v1002_v37 = vsel %vm2873_vm0, %v1910_v33, %v1905_v29  ;;  %v1001_v38 = vsel %vm2874_vm6, %v1909_v34, %v1904_v32  ;;  %vm2875_vm13 = vmmov %vm2873_vm0 }
 0x237   : > { %v1923_v36 = vpop.permute.xlu0 %1922  ;;  %1042 = vmatprep.subr.bf16.mxu1 %v2540_v46  ;;  %v1915_v39 = vunpack.i.h.bf16 %v1913_v35  ;;  %v1914_v41 = vunpack.i.l.bf16 %v1913_v35  ;;  %v998_v50 = vsel %vm2875_vm13, %v1905_v29, %v1910_v33  ;;  %vm2876_vm9 = vmmov %vm2873_vm0  ;;  %v1581_v51 = vpack.c.bf16 %v1002_v37, %v1001_v38 }
 0x238   : > { %v1925_v42 = vunpack.i.h.bf16 %v1923_v36  ;;  %v1924_v43 = vunpack.i.l.bf16 %v1923_v36  ;;  %v997_v46 = vsel %vm2876_vm9, %v1904_v32, %v1909_v34  ;;  %vm2877_vm6 = vmmov %vm2873_vm0 }
 0x239   : > { %v1584_v60 = vpack.c.bf16 %v998_v50, %v997_v46  ;;  %vm2878_vm9 = vmmov %vm2873_vm0 }
 0x23a   : > { %v1918_v48 = vpop.permute.xlu1 %1917  ;;  %1043 = vmatpush1.bf16.msra.mxu1 %v2542_v47  ;;  %v1004_v58 = vsel %vm2873_vm0, %v1925_v42, %v1915_v39  ;;  %v1003_v47 = vsel %vm2877_vm6, %v1924_v43, %v1914_v41  ;;  %v1000_v61 = vsel %vm2878_vm9, %v1915_v39, %v1925_v42  ;;  %vm2879_vm13 = vmmov %vm2873_vm0  ;;  %vm2880_vm0 = vcmp.lt.s32.totalorder %v2206_v18, 17 }
 0x23b   : > { %v1928_v49 = vpop.permute.xlu0 %1927  ;;  %1044 = vmatprep.subr.bf16.mxu1 %v2546_v54  ;;  %v1920_v52 = vunpack.i.h.bf16 %v1918_v48  ;;  %v1919_v53 = vunpack.i.l.bf16 %v1918_v48  ;;  %v999_v62 = vsel %vm2879_vm13, %v1914_v41, %v1924_v43  ;;  %v1587_v11 = vpack.c.bf16 %v1004_v58, %v1003_v47  ;;  %vm2881_vm6 = vmmov %vm2880_vm0 }
 0x23c   : > { %v1930_v31 = vunpack.i.h.bf16 %v1928_v49  ;;  %v1929_v56 = vunpack.i.l.bf16 %v1928_v49  ;;  %v1590_v2 = vpack.c.bf16 %v1000_v61, %v999_v62  ;;  %vm2882_vm9 = vmmov %vm2880_vm0 }
 0x23d   : > { %vm2883_vm13 = vmmov %vm2880_vm0 }
 0x23e   : > { %v1933_v59 = vpop.permute.xlu1 %1932  ;;  %1045 = vmatpush1.bf16.msra.mxu1 %v2548_v55  ;;  %v846_v19 = vsel %vm2880_vm0, %v1920_v52, %v1930_v31  ;;  %v845_v3 = vsel %vm2881_vm6, %v1919_v53, %v1929_v56  ;;  %v850_v4 = vsel %vm2882_vm9, %v1930_v31, %v1920_v52  ;;  %v849_v13 = vsel %vm2883_vm13, %v1929_v56, %v1919_v53  ;;  %vm2884_vm6 = vmmov %vm2880_vm0  ;;  %v2048_v53 = vld [vmem:[%s2836_s3 + $0x18] sm:$0xff]  }
 0x23f   : > { %v1943_v54 = vpop.permute.xlu0 %1942  ;;  %1582 = vmatprep.subr.msk.bf16.mxu1 %vm2290_vm7, %v1581_v51  ;;  %v1935_v7 = vunpack.i.h.bf16 %v1933_v59  ;;  %v1934_v55 = vunpack.i.l.bf16 %v1933_v59  ;;  %v1597_v5 = vpack.c.bf16 %v846_v19, %v845_v3  ;;  %v1600_v27 = vpack.c.bf16 %v850_v4, %v849_v13  ;;  %vm2885_vm9 = vmmov %vm2880_vm0 }
 0x240   : > { %v1945_v8 = vunpack.i.h.bf16 %v1943_v54  ;;  %v1944_v9 = vunpack.i.l.bf16 %v1943_v54  ;;  %vm2886_vm13 = vmmov %vm2880_vm0 }
 0x242   : > { %v1938_v30 = vpop.permute.xlu1 %1937  ;;  %1585 = vmatpush1.bf16.msk.msra.mxu1 %vm2310_vm10, %v1584_v60  ;;  %v848_v21 = vsel %vm2880_vm0, %v1935_v7, %v1945_v8  ;;  %v847_v22 = vsel %vm2884_vm6, %v1934_v55, %v1944_v9  ;;  %v852_v28 = vsel %vm2885_vm9, %v1945_v8, %v1935_v7  ;;  %v851_v29 = vsel %vm2886_vm13, %v1944_v9, %v1934_v55 }
 0x243   : > { %v1948_v10 = vpop.permute.xlu0 %1947  ;;  %1588 = vmatprep.subr.msk.bf16.mxu1 %vm2290_vm7, %v1587_v11  ;;  %v1940_v14 = vunpack.i.h.bf16 %v1938_v30  ;;  %v1939_v15 = vunpack.i.l.bf16 %v1938_v30  ;;  %v1603_v32 = vpack.c.bf16 %v848_v21, %v847_v22  ;;  %vm2887_vm0 = vcmp.lt.s32.totalorder %v2206_v18, 16 }
 0x244   : > { %v1950_v16 = vunpack.i.h.bf16 %v1948_v10  ;;  %v1949_v17 = vunpack.i.l.bf16 %v1948_v10  ;;  %vm2888_vm6 = vmmov %vm2887_vm0  ;;  %v1606_v42 = vpack.c.bf16 %v852_v28, %v851_v29 }
 0x245   : > { %vm2889_vm9 = vmmov %vm2887_vm0 }
 0x246   : > { %v1953_v1 = vpop.permute.xlu1 %1952  ;;  %1591 = vmatpush1.bf16.msk.msra.mxu1 %vm2310_vm10, %v1590_v2  ;;  %v881_v33 = vsel %vm2887_vm0, %v1939_v15, %v1949_v17  ;;  %v882_v34 = vsel %vm2888_vm6, %v1940_v14, %v1950_v16  ;;  %v886_v43 = vsel %vm2889_vm9, %v1950_v16, %v1940_v14  ;;  %vm2890_vm13 = vmmov %vm2887_vm0 }
 0x247   : > { %v1963_v26 = vpop.permute.xlu0 %1962  ;;  %1598 = vmatprep.subr.msk.bf16.mxu1 %vm2235_vm3, %v1597_v5  ;;  %v1955_v35 = vunpack.i.h.bf16 %v1953_v1  ;;  %v1954_v36 = vunpack.i.l.bf16 %v1953_v1  ;;  %v885_v48 = vsel %vm2890_vm13, %v1949_v17, %v1939_v15  ;;  %v898_v49 = vpack.c.bf16 %v882_v34, %v881_v33  ;;  %vm2892_vm6 = vmmov %vm2887_vm0 }
 0x248   : > { %v1965_v37 = vunpack.i.h.bf16 %v1963_v26  ;;  %v1964_v38 = vunpack.i.l.bf16 %v1963_v26  ;;  %v1609_v47 = vpack.c.bf16 %v886_v43, %v885_v48  ;;  %vm2893_vm9 = vmmov %vm2887_vm0  ;;  %v2049_v48 = vld [vmem:[%s2836_s3] sm:$0xff]  }
 0x249   : > { %1592 = vmatmul.mubr.msk.bf16.vlgmr.msra.gmra.mrb[0].mxu1 %vm471_vm14, %v2047_v20 }
 0x24a   : > { %v1958_v39 = vpop.permute.xlu1 %1957  ;;  %1601 = vmatpush1.bf16.msk.msra.mxu1 %vm2347_vm15, %v1600_v27  ;;  %1080 = vmatprep.mubr.bf16.mxu1 %v2072_v12  ;;  %v884_v56 = vsel %vm2887_vm0, %v1955_v35, %v1965_v37  ;;  %v888_v59 = vsel %vm2892_vm6, %v1965_v37, %v1955_v35  ;;  %v887_v54 = vsel %vm2893_vm9, %v1964_v38, %v1954_v36  ;;  %vm2902_vm9 = vcmp.lt.s32.totalorder %v2206_v18, 112 }
 0x24b   : > { %v1968_v41 = vpop.permute.xlu0 %1967  ;;  %1604 = vmatprep.subr.msk.bf16.mxu1 %vm2235_vm3, %v1603_v32  ;;  %v1960_v50 = vunpack.i.h.bf16 %v1958_v39  ;;  %v1959_v46 = vunpack.i.l.bf16 %v1958_v39  ;;  %vm2891_vm3 = vmmov %vm2887_vm0  ;;  %v1612_v8 = vpack.c.bf16 %v888_v59, %v887_v54 }
 0x24c   : > { %v1970_v51 = vunpack.i.h.bf16 %v1968_v41  ;;  %v1969_v52 = vunpack.i.l.bf16 %v1968_v41  ;;  %v883_v31 = vsel %vm2891_vm3, %v1954_v36, %v1964_v38 }
 0x24d   : > { %v900_v61 = vpack.c.bf16 %v884_v56, %v883_v31 }
 0x24e   : > { %v1973_v40 = vpop.permute.xlu1 %1972  ;;  %1607 = vmatpush1.bf16.msk.msra.mxu1 %vm2347_vm15, %v1606_v42  ;;  %v918_v60 = vsel %vm353_vm2, %v1960_v50, %v1970_v51  ;;  %v917_v57 = vsel %vm353_vm2, %v1959_v46, %v1969_v52  ;;  %v922_v9 = vsel %vm353_vm2, %v1970_v51, %v1960_v50  ;;  %v921_v30 = vsel %vm353_vm2, %v1969_v52, %v1959_v46 }
 0x24f   : > { %v1983_v58 = vpop.permute.xlu0 %1982  ;;  %1111 = vmatprep.subr.bf16.mxu1 %v898_v49  ;;  %v1975_v62 = vunpack.i.h.bf16 %v1973_v40  ;;  %v1974_v11 = vunpack.i.l.bf16 %v1973_v40  ;;  %v1615_v10 = vpack.c.bf16 %v918_v60, %v917_v57  ;;  %v1618_v20 = vpack.c.bf16 %v922_v9, %v921_v30 }
 0x250   : > { %v1985_v19 = vunpack.i.h.bf16 %v1983_v58  ;;  %v1984_v3 = vunpack.i.l.bf16 %v1983_v58  ;;  %vm2894_vm15 = vcmp.lt.s32.totalorder %v2206_v18, 113 }
 0x251   : > { %1593 = vmatmul.mubr.msk.bf16.gmra.mrb[4].mxu1 %vm471_vm14, %v2048_v53  ;;  %vm2895_vm13 = vmmov %vm2894_vm15 }
 0x252   : > { %v1978_v7 = vpop.permute.xlu1 %1977  ;;  %1610 = vmatpush1.bf16.msk.msra.mxu1 %vm2382_vm12, %v1609_v47  ;;  %1139 = vmatprep.mubr.bf16.mxu1 %v2072_v12  ;;  %v920_v14 = vsel %vm353_vm2, %v1975_v62, %v1985_v19  ;;  %v919_v15 = vsel %vm353_vm2, %v1974_v11, %v1984_v3  ;;  %v924_v21 = vsel %vm353_vm2, %v1985_v19, %v1975_v62 }
 0x253   : > { %v1988_v55 = vpop.permute.xlu0 %1987  ;;  %1113 = vmatprep.subr.bf16.mxu1 %v900_v61  ;;  %v1980_v2 = vunpack.i.h.bf16 %v1978_v7  ;;  %v1979_v4 = vunpack.i.l.bf16 %v1978_v7  ;;  %v923_v22 = vsel %vm353_vm2, %v1984_v3, %v1974_v11  ;;  %v1621_v1 = vpack.c.bf16 %v920_v14, %v919_v15  ;;  %vm2896_vm2 = vmmov %vm2895_vm13 }
 0x254   : > { %v1990_v13 = vunpack.i.h.bf16 %v1988_v55  ;;  %v1989_v5 = vunpack.i.l.bf16 %v1988_v55  ;;  %v1624_v35 = vpack.c.bf16 %v924_v21, %v923_v22  ;;  %vm2898_vm3 = vmmov %vm2896_vm2 }
 0x255   : > { %vm2900_vm0 = vmmov %vm2896_vm2 }
 0x256   : > { %v1993_v16 = vpop.permute.xlu1 %1992  ;;  %1613 = vmatpush1.bf16.msk.msra.mxu1 %vm2382_vm12, %v1612_v8  ;;  %v1181_v26 = vsel %vm2894_vm15, %v1990_v13, %v1980_v2  ;;  %v1180_v27 = vsel %vm2895_vm13, %v1989_v5, %v1979_v4  ;;  %v1177_v36 = vsel %vm2896_vm2, %v1980_v2, %v1990_v13  ;;  %vm2897_vm12 = vmmov %vm2896_vm2  ;;  %v2050_v8 = vld [vmem:[%s2836_s3 + $0x8] sm:$0xff]  }
 0x257   : > { %v2003_v17 = vpop.permute.xlu0 %2002  ;;  %1616 = vmatprep.subr.msk.bf16.mxu1 %vm2290_vm7, %v1615_v10  ;;  %v1995_v25 = vunpack.i.h.bf16 %v1993_v16  ;;  %v1994_v28 = vunpack.i.l.bf16 %v1993_v16  ;;  %v1176_v37 = vsel %vm2897_vm12, %v1979_v4, %v1989_v5  ;;  %v1635_v38 = vpack.c.bf16 %v1181_v26, %v1180_v27  ;;  %vm2901_vm6 = vmmov %vm2900_vm0 }
 0x258   : > { %v2005_v29 = vunpack.i.h.bf16 %v2003_v17  ;;  %v2004_v32 = vunpack.i.l.bf16 %v2003_v17  ;;  %v1638_v51 = vpack.c.bf16 %v1177_v36, %v1176_v37  ;;  %vm2903_vm15 = vmmov %vm2902_vm9 }
 0x25a   : > { %v1998_v33 = vpop.permute.xlu1 %1997  ;;  %1619 = vmatpush1.bf16.msk.msra.mxu1 %vm2416_vm8, %v1618_v20  ;;  %v1183_v24 = vsel %vm2898_vm3, %v2005_v29, %v1995_v25  ;;  %v1179_v52 = vsel %vm2900_vm0, %v1995_v25, %v2005_v29  ;;  %v1178_v53 = vsel %vm2901_vm6, %v1994_v28, %v2004_v32 }
 0x25b   : > { %v2008_v34 = vpop.permute.xlu0 %2007  ;;  %1622 = vmatprep.subr.msk.bf16.mxu1 %vm2290_vm7, %v1621_v1  ;;  %v2000_v39 = vunpack.i.h.bf16 %v1998_v33  ;;  %v1999_v41 = vunpack.i.l.bf16 %v1998_v33  ;;  %vm2899_vm7 = vmmov %vm2896_vm2  ;;  %v1644_v57 = vpack.c.bf16 %v1179_v52, %v1178_v53 }
 0x25c   : > { %v2010_v42 = vunpack.i.h.bf16 %v2008_v34  ;;  %v2009_v43 = vunpack.i.l.bf16 %v2008_v34  ;;  %v1182_v49 = vsel %vm2899_vm7, %v2004_v32, %v1994_v28  ;;  %vm2910_vm7 = vcmp.lt.s32.totalorder %v2206_v18, 111  ;;  %v2051_v34 = vld [vmem:[%s2836_s3 + $0x20] sm:$0xff]   ;;  %v2052_v18 = vld [vmem:[%s2836_s3 + $0x28] sm:$0xff]  }
 0x25d   : > { %v1641_v40 = vpack.c.bf16 %v1183_v24, %v1182_v49  ;;  %vm2911_vm0 = vmmov %vm2910_vm7 }
 0x25e   : > { %v2013_v50 = vpop.permute.xlu1 %2012  ;;  %1625 = vmatpush1.bf16.msk.msra.mxu1 %vm2416_vm8, %v1624_v35  ;;  %v1217_v31 = vsel %vm2902_vm9, %v2010_v42, %v2000_v39  ;;  %v1216_v56 = vsel %vm2903_vm15, %v2009_v43, %v1999_v41  ;;  %vm2904_vm8 = vmmov %vm2902_vm9 }
 0x25f   : > { %v2023_v46 = vpop.permute.xlu0 %2022  ;;  %1636 = vmatprep.subr.msk.bf16.mxu1 %vm2440_vm1, %v1635_v38  ;;  %v2015_v0 = vunpack.i.h.bf16 %v2013_v50  ;;  %v2014_v58 = vunpack.i.l.bf16 %v2013_v50  ;;  %v1213_v61 = vsel %vm2904_vm8, %v2000_v39, %v2010_v42  ;;  %vm2905_vm13 = vmmov %vm2904_vm8  ;;  %v1647_v11 = vpack.c.bf16 %v1217_v31, %v1216_v56  ;;  %v2053_v39 = vld [vmem:[%s2124_s23] sm:$0xff]  ;;  %v2055_v50 = vld [vmem:[%s2124_s23 + $0x10] sm:$0xff] }
 0x260   : > { %v2025_v47 = vunpack.i.h.bf16 %v2023_v46  ;;  %v2024_v59 = vunpack.i.l.bf16 %v2023_v46  ;;  %v1212_v62 = vsel %vm2905_vm13, %v1999_v41, %v2009_v43  ;;  %vm2913_vm6 = vmmov %vm2911_vm0 }
 0x261   : > { %1626 = vmatmul.mubr.msk.bf16.vlgmr.msra.gmra.mrb[0].mxu1 %vm471_vm14, %v2049_v48  ;;  %v1228_v2 = vpack.c.bf16 %v1213_v61, %v1212_v62  ;;  %vm2914_vm9 = vmmov %vm2911_vm0  ;;  %v2054_v48 = vld [vmem:[%s2124_s23 + $0x8] sm:$0xff] }
 0x262   : > { %v2018_v54 = vpop.permute.xlu1 %2017  ;;  %1639 = vmatpush1.bf16.msk.msra.mxu1 %vm2246_vm4, %v1638_v51  ;;  %1149 = vmatprep.mubr.bf16.mxu1 %v2072_v12  ;;  %vm2915_vm15 = vmmov %vm2911_vm0  ;;  %v2056_v51 = vld [vmem:[%s2124_s23 + $0x18] sm:$0xff]  ;;  %v2058_v61 = vld [vmem:[%s2124_s23 + $0x28] sm:$0xff] }
 0x263   : > { %v2028_v60 = vpop.permute.xlu0 %2027  ;;  %1642 = vmatprep.subr.msk.bf16.mxu1 %vm2440_vm1, %v1641_v40  ;;  %v2020_v19 = vunpack.i.h.bf16 %v2018_v54  ;;  %v2019_v3 = vunpack.i.l.bf16 %v2018_v54  ;;  %vm2906_vm1 = vmmov %vm2904_vm8 }
 0x264   : > { %v2030_v7 = vunpack.i.h.bf16 %v2028_v60  ;;  %v2029_v55 = vunpack.i.l.bf16 %v2028_v60  ;;  %v1219_v6 = vsel %vm2906_vm1, %v2025_v47, %v2015_v0  ;;  %vm2907_vm2 = vmmov %vm2906_vm1 }
 0x265   : > { %v1218_v9 = vsel %vm2907_vm2, %v2024_v59, %v2014_v58  ;;  %vm2908_vm12 = vmmov %vm2906_vm1 }
 0x266   : > { %1645 = vmatpush1.bf16.msk.msra.mxu1 %vm2246_vm4, %v1644_v57  ;;  %v2033_v30 = vpop.permute.xlu1 %2032  ;;  %v1215_v4 = vsel %vm2908_vm12, %v2015_v0, %v2025_v47  ;;  %vm2909_vm3 = vmmov %vm2906_vm1  ;;  %v1650_v5 = vpack.c.bf16 %v1219_v6, %v1218_v9  ;;  %v1253_v14 = vsel %vm2910_vm7, %v2030_v7, %v2020_v19  ;;  %v1252_v45 = vsel %vm2911_vm0, %v2029_v55, %v2019_v3 }
 0x267   : > { %v2038_v10 = vpop.permute.xlu0 %2037  ;;  %1648 = vmatprep.subr.msk.bf16.mxu1 %vm2477_vm11, %v1647_v11  ;;  %v1214_v13 = vsel %vm2909_vm3, %v2014_v58, %v2024_v59  ;;  %v2035_v15 = vunpack.i.h.bf16 %v2033_v30  ;;  %v2034_v16 = vunpack.i.l.bf16 %v2033_v30  ;;  %vm2912_vm4 = vmmov %vm2911_vm0  ;;  %v1248_v1 = vsel %vm2913_vm6, %v2019_v3, %v2029_v55  ;;  %v2057_v59 = vld [vmem:[%s2124_s23 + $0x20] sm:$0xff] }
 0x268   : > { %v2040_v17 = vunpack.i.h.bf16 %v2038_v10  ;;  %v2039_v20 = vunpack.i.l.bf16 %v2038_v10  ;;  %v1230_v21 = vpack.c.bf16 %v1215_v4, %v1214_v13  ;;  %v1249_v22 = vsel %vm2912_vm4, %v2020_v19, %v2030_v7  ;;  %vm2917_vm8 = vmmov %vm2911_vm0  ;;  %v2059_v19 = vld [vmem:[%s2124_s23 + $0x30] sm:$0xff]  ;;  %v2060_v7 = vld [vmem:[%s2124_s23 + $0x38] sm:$0xff] }
 0x269   : > { %1627 = vmatmul.mubr.msk.bf16.gmra.mrb[4].mxu1 %vm471_vm14, %v2050_v8  ;;  %v1653_v26 = vpack.c.bf16 %v1253_v14, %v1252_v45  ;;  %v1656_v44 = vpack.c.bf16 %v1249_v22, %v1248_v1 }
 0x26a   : > { %1294 = vmatpush1.bf16.msra.mxu1 %v1228_v2  ;;  %1321 = vmatprep.mubr.bf16.mxu1 %v2072_v12  ;;  %v1255_v27 = vsel %vm2914_vm9, %v2040_v17, %v2035_v15  ;;  %v1254_v25 = vsel %vm2915_vm15, %v2039_v20, %v2034_v16  ;;  %v1250_v29 = vsel %vm2917_vm8, %v2034_v16, %v2039_v20 }
 0x26b   : > { %1651 = vmatprep.subr.msk.bf16.mxu1 %vm2477_vm11, %v1650_v5  ;;  %vm2916_vm11 = vmmov %vm2911_vm0  ;;  %v1659_v32 = vpack.c.bf16 %v1255_v27, %v1254_v25 }
 0x26c   : > { %v1251_v28 = vsel %vm2916_vm11, %v2035_v15, %v2040_v17 }
 0x26d   : > { %v1662_v33 = vpack.c.bf16 %v1251_v28, %v1250_v29 }
 0x26e   : > { %1296 = vmatpush1.bf16.msra.mxu1 %v1230_v21 }
 0x26f   : > { %1654 = vmatprep.subr.msk.bf16.mxu1 %vm2513_vm5, %v1653_v26 }
 0x272   : > { %1657 = vmatpush1.bf16.msk.msra.mxu1 %vm2310_vm10, %v1656_v44 }
 0x273   : > { %1660 = vmatprep.subr.msk.bf16.mxu1 %vm2513_vm5, %v1659_v32 }
 0x276   : > { %1663 = vmatpush1.bf16.msk.msra.mxu1 %vm2310_vm10, %v1662_v33 }
 0x277   : > { %v1353_v63 = vpop.permute.xlu1 %1352 }
 0x278   : > { %v1358_v38 = vpop.permute.xlu0 %1357 }
 0x279   : > { %1664 = vmatmul.mubr.msk.bf16.vlgmr.msra.gmra.mrb[0].mxu1 %vm471_vm14, %v2051_v34 }
 0x27a   : > { %1331 = vmatprep.mubr.bf16.mxu1 %v2072_v12 }
 0x27b   : > { %v1363_v53 = vpop.permute.xlu1 %1362 }
 0x27c   : > { %v1368_v0 = vpop.permute.xlu0 %1367 }
 0x281   : > { %1665 = vmatmul.mubr.msk.bf16.gmra.mrb[4].mxu1 %vm471_vm14, %v2052_v18 }
 0x34c   : > { %v1323_v35 = vpop.f32.mrb[0].mxu1 }
 0x34d   : > { %v1370_v36 = vadd.f32 %v1353_v63, %v1323_v35  ;;  %v1325_v37 = vpop.f32.mrb[1].mxu1 }
 0x34e   : > { %v1371_v12 = vadd.f32 %v1353_v63, %v1325_v37  ;;  %v1327_v23 = vpop.f32.mrb[2].mxu1 }
 0x34f   : > { %v1378_v41 = vadd.f32 %v2053_v39, %v1370_v36  ;;  %v1372_v42 = vadd.f32 %v1358_v38, %v1327_v23  ;;  %v1329_v43 = vpop.f32.mrb[3].mxu1 }
 0x350   : > { %v1379_v24 = vadd.f32 %v2054_v48, %v1371_v12  ;;  %v1373_v49 = vadd.f32 %v1358_v38, %v1329_v43 }
 0x351   : > { %1386 = vst [vmem:[%s2812_s25] sm:$0xff] %v1378_v41  ;;  %v1380_v46 = vadd.f32 %v2055_v50, %v1372_v42 }
 0x352   : > { %1387 = vst [vmem:[%s2812_s25 + $0x8] sm:$0xff] %v1379_v24  ;;  %v1381_v52 = vadd.f32 %v2056_v51, %v1373_v49 }
 0x353   : > { %1388 = vst [vmem:[%s2812_s25 + $0x10] sm:$0xff] %v1380_v46 }
 0x354   : > { %1389 = vst [vmem:[%s2812_s25 + $0x18] sm:$0xff] %v1381_v52  ;;  %v1333_v40 = vpop.f32.mrb[4].mxu1 }
 0x355   : > { %v1374_v31 = vadd.f32 %v1363_v53, %v1333_v40  ;;  %v1335_v56 = vpop.f32.mrb[5].mxu1 }
 0x356   : > { %v1375_v58 = vadd.f32 %v1363_v53, %v1335_v56  ;;  %v1337_v47 = vpop.f32.mrb[6].mxu1 }
 0x357   : > { %v1382_v54 = vadd.f32 %v2057_v59, %v1374_v31  ;;  %v1376_v60 = vadd.f32 %v1368_v0, %v1337_v47  ;;  %v1339_v57 = vpop.f32.mrb[7].mxu1 }
 0x358   : > { %v1383_v62 = vadd.f32 %v2058_v61, %v1375_v58  ;;  %v1377_v11 = vadd.f32 %v1368_v0, %v1339_v57 }
 0x359   : > { %1390 = vst [vmem:[%s2812_s25 + $0x20] sm:$0xff] %v1382_v54  ;;  %v1384_v3 = vadd.f32 %v2059_v19, %v1376_v60 }
 0x35a   : > { %1391 = vst [vmem:[%s2812_s25 + $0x28] sm:$0xff] %v1383_v62  ;;  %v1385_v55 = vadd.f32 %v2060_v7, %v1377_v11 }
 0x35b   : > { %1392 = vst [vmem:[%s2812_s25 + $0x30] sm:$0xff] %v1384_v3 }
 0x35c   : > { %1393 = vst [vmem:[%s2812_s25 + $0x38] sm:$0xff] %v1385_v55 }
 0x35d PF: > { %s15_s18 = sadd.s32 1, %s2067_s18  }
 0x35e   : > { %p12_p4 = scmp.ge.s32.totalorder %s15_s18, 4  }
 0x360   :  { %14 = sbr.rel (!%p12_p4) target bundleno = 1 (0x1), region = 74 }

</bundles_post_ra>
